<compile_context>
chip_gen: v5e
topology: v5e:2x2
jax: 0.10.0
libtpu: 0.0.40
codegen_flags: <defaults>
</compile_context>

<pallas_src>
import functools
import numpy as np

import jax
import jax.numpy as jnp
from jax.experimental import pallas as pl
from jax.experimental.pallas import tpu as pltpu


# ----------------------------------------------------------------------------
# Host-side skeleton helpers (static index math, no tensor compute)
# ----------------------------------------------------------------------------
def find_neighbor(edges, dist):
    """Edge-graph neighbours within `dist` (two edges sharing a joint => distance 1)."""
    n = len(edges)
    INF = 10 ** 6
    mat = [[INF] * n for _ in range(n)]
    for i in range(n):
        mat[i][i] = 0
    for i, a in enumerate(edges):
        for j, b in enumerate(edges):
            if i != j and len({a[0], a[1]} & {b[0], b[1]}) > 0:
                mat[i][j] = 1
    for k in range(n):
        for i in range(n):
            for j in range(n):
                if mat[i][k] + mat[k][j] < mat[i][j]:
                    mat[i][j] = mat[i][k] + mat[k][j]
    return [[j for j in range(n) if mat[i][j] <= dist] for i in range(n)]


def skeleton_pool(edges, channels_per_edge, last_pool):
    """'mean' SkeletonPool -> (pooling weight matrix, new_edges, pooling_list)."""
    edge_num = len(edges)
    degree = {}
    for e in edges:
        degree[e[0]] = degree.get(e[0], 0) + 1
        degree[e[1]] = degree.get(e[1], 0) + 1

    seq_list = []

    def find_seq(j, seq):
        if degree[j] > 2 and j != 0:
            seq_list.append(seq)
            seq = []
        if degree[j] == 1:
            seq_list.append(seq)
            return
        for idx, e in enumerate(edges):
            if e[0] == j:
                find_seq(e[1], seq + [idx])

    find_seq(0, [])

    pooling_list, new_edges = [], []
    for seq in seq_list:
        if last_pool:
            pooling_list.append(seq)
            continue
        if len(seq) % 2 == 1:
            pooling_list.append([seq[0]])
            new_edges.append(edges[seq[0]])
            seq = seq[1:]
        for i in range(0, len(seq), 2):
            pooling_list.append([seq[i], seq[i + 1]])
            new_edges.append((edges[seq[i]][0], edges[seq[i + 1]][1]))

    weight = np.zeros((len(pooling_list) * channels_per_edge,
                       edge_num * channels_per_edge), np.float32)
    for i, group in enumerate(pooling_list):
        for j in group:
            for c in range(channels_per_edge):
                weight[i * channels_per_edge + c, j * channels_per_edge + c] = 1.0 / len(group)
    return weight, new_edges, pooling_list


def skeleton_conv_mask(neighbour_list, in_channels, out_channels, joint_num, kernel_size):
    """SkeletonConv weight mask: output joint i only sees its neighbour joints' channels."""
    icpj = in_channels // joint_num
    ocpj = out_channels // joint_num
    mask = np.zeros((out_channels, in_channels, kernel_size), np.float32)
    for i, nbrs in enumerate(neighbour_list):
        cols = [k * icpj + c for k in nbrs for c in range(icpj)]
        mask[i * ocpj:(i + 1) * ocpj, cols, :] = 1.0
    return mask


# ----------------------------------------------------------------------------
# Fused Pallas kernel: both SkeletonResidual layers, per batch element
# ----------------------------------------------------------------------------
def _fused_local_encoder_kernel(
        x1c_ref,
        w1r_ref, b1r_ref, gam1_ref, bet1_ref, w1s_ref, b1s_ref, red1_ref, sct1_ref, pool1_ref,
        w2r_ref, b2r_ref, gam2_ref, bet2_ref, w2s_ref, b2s_ref, red2_ref, sct2_ref, pool2_ref,
        o_ref,
        *, cin1, cin2, t1_out, inv_n1, inv_n2, conv_dtype):
    f32 = jnp.float32

    def group_norm(a, red_ref, sct_ref, gam_ref, bet_ref, inv_n):
        # Per-group stats: one (2, Cout) @ (Cout, G) matmul on stacked [sum, sumsq],
        # E[x^2] - mean^2, then one (2, G) @ (G, Cout) scatter back to channels.
        s = jnp.concatenate([jnp.sum(a, axis=0, keepdims=True),
                             jnp.sum(a * a, axis=0, keepdims=True)], axis=0)      # (2, Cout)
        g = jnp.dot(s, red_ref[...], preferred_element_type=f32) * inv_n          # (2, G)
        mean_g = g[0:1]
        inv_g = jax.lax.rsqrt(g[1:2] - mean_g * mean_g + 1e-5)
        mi = jnp.concatenate([mean_g, inv_g], axis=0)                             # (2, G)
        mi_c = jnp.dot(mi, sct_ref[...], preferred_element_type=f32)              # (2, Cout)
        return (a - mi_c[0:1]) * mi_c[1:2] * gam_ref[...] + bet_ref[...]

    # ---- layer 1: rows are output times in phase order [0,2,4,...,1,3,5,...] -----------
    x1c = x1c_ref[...]                                             # (T1, 4*Cin1), conv_dtype
    # Residual branch: the whole 4-tap stride-2 conv is ONE K = 4*Cin1 matmul.
    a1 = jnp.dot(x1c, w1r_ref[...], preferred_element_type=f32) + b1r_ref[...]    # (T1, Cout1)
    y1 = group_norm(a1, red1_ref, sct1_ref, gam1_ref, bet1_ref, inv_n1)
    # Shortcut branch (1x1 conv, stride 2): its input x[2t] is exactly the k=1 tap block.
    z1 = jnp.dot(x1c[:, cin1:2 * cin1], w1s_ref[...],
                 preferred_element_type=f32) + b1s_ref[...]
    # SkeletonPool ('mean') as channel-mixing matmul, then Tanh.
    h1 = jnp.tanh(jnp.dot(y1 + z1, pool1_ref[...], preferred_element_type=f32))   # (T1, Cin2)

    # ---- layer 2: even/odd time phases are contiguous row blocks of h1 -----------------
    h1c = h1.astype(conv_dtype)
    half = t1_out // 2                                             # == T2_out
    even = h1c[0:half]                                             # h1 at times 0,2,4,...
    odd = h1c[half:t1_out]                                         # h1 at times 1,3,5,...
    zrow = jnp.zeros((1, cin2), conv_dtype)
    odd_dn = jnp.concatenate([zrow, odd[0:half - 1]], axis=0)      # tap k=0 : h1[2t-1]
    even_up = jnp.concatenate([even[1:half], zrow], axis=0)        # tap k=3 : h1[2t+2]

    # Per-tap K=Cin2 matmuls assembled from contiguous phase slices.  A single K=4*Cin2
    # matmul would need a lane-dim concat at non-128 offsets (XLU shifts / relayout);
    # the MXU sees the same total K either way.
    w2r = w2r_ref[...]                                             # (4, Cin2, Cout2)
    a2 = jnp.dot(odd_dn, w2r[0], preferred_element_type=f32)
    a2 = a2 + jnp.dot(even, w2r[1], preferred_element_type=f32)    # tap k=1 : h1[2t]
    a2 = a2 + jnp.dot(odd, w2r[2], preferred_element_type=f32)     # tap k=2 : h1[2t+1]
    a2 = a2 + jnp.dot(even_up, w2r[3], preferred_element_type=f32)
    a2 = a2 + b2r_ref[...]
    y2 = group_norm(a2, red2_ref, sct2_ref, gam2_ref, bet2_ref, inv_n2)
    z2 = jnp.dot(even, w2s_ref[...], preferred_element_type=f32) + b2s_ref[...]
    o_ref[...] = jnp.tanh(jnp.dot(y2 + z2, pool2_ref[...], preferred_element_type=f32))


# ----------------------------------------------------------------------------
# Wrapper: host-side im2col (phase-permuted rows) + single pallas_call
# ----------------------------------------------------------------------------
def _im2col_phase_permuted(x, kernel_size=4, stride=2, padding=1):
    """(B, T, C) -> (B, T_out, K*C) conv patches; output-time rows ordered evens-then-odds."""
    B, T, C = x.shape
    x_pad = jnp.pad(x, ((0, 0), (padding, padding), (0, 0)))       # padding_mode='constant'
    t_out = (T + 2 * padding - kernel_size) // stride + 1
    order = list(range(0, t_out, 2)) + list(range(1, t_out, 2))
    rows = [x_pad[:, stride * t:stride * t + kernel_size, :].reshape(B, 1, kernel_size * C)
            for t in order]
    return jnp.concatenate(rows, axis=1), t_out


def local_encoder_forward(x, layers, *, conv_dtype=jnp.bfloat16):
    """Fused 2-layer LocalEncoder forward.  x: (B, T, C) -> (B, T//4, C_out)."""
    assert len(layers) == 2, "fused kernel implements the vae_layer=2 LocalEncoder config"
    l1, l2 = layers
    B, T, C = x.shape
    assert C == l1['in_ch'] and T % 4 == 0

    x1_col, t1_out = _im2col_phase_permuted(x)                     # (B, T1, 4*Cin1)
    x1_col = x1_col.astype(conv_dtype)
    t2_out = t1_out // 2
    cin1, cin2 = l1['in_ch'], l2['in_ch']
    assert l1['pool'].shape[1] == cin2
    c_out = l2['pool'].shape[1]
    inv_n1 = 1.0 / float(t1_out * (l1['out_ch'] // l1['num_groups']))
    inv_n2 = 1.0 / float(t2_out * (l2['out_ch'] // l2['num_groups']))

    # layer-1 conv weight flattened to (4*Cin1, Cout1) for the single K=4*Cin1 matmul
    w1_res_flat = l1['w_res'].reshape(-1, l1['out_ch'])

    kernel = functools.partial(
        _fused_local_encoder_kernel,
        cin1=cin1, cin2=cin2, t1_out=t1_out,
        inv_n1=inv_n1, inv_n2=inv_n2, conv_dtype=conv_dtype)

    def rep_spec(a):                                               # whole array, block reused
        zeros = (0,) * a.ndim                                      # every grid step (no re-DMA)
        return pl.BlockSpec(a.shape, lambda b, _z=zeros: _z)

    params = [
        w1_res_flat, l1['b_res'], l1['gamma'], l1['beta'], l1['w_sc'], l1['b_sc'],
        l1['grp_reduce'], l1['grp_scatter'], l1['pool'],
        l2['w_res'], l2['b_res'], l2['gamma'], l2['beta'], l2['w_sc'], l2['b_sc'],
        l2['grp_reduce'], l2['grp_scatter'], l2['pool'],
    ]

    # TODO(synk): for realistic motion lengths (T >> 16) add time tiling on the im2col /
    # output BlockSpecs (lane dim multiple of 128) before whole-T blocks outgrow VMEM
    # (v7x has only 64 MiB).  Not needed at these shapes.
    return pl.pallas_call(
        kernel,
        out_shape=jax.ShapeDtypeStruct((B, t2_out, c_out), jnp.float32),
        grid=(B,),
        in_specs=[pl.BlockSpec((None, t1_out, x1_col.shape[-1]), lambda b: (b, 0, 0))]
                + [rep_spec(a) for a in params],
        out_specs=pl.BlockSpec((None, t2_out, c_out), lambda b: (b, 0, 0)),
        # batch items are independent -> "parallel" lets v7x split them over its 2 TCs
        compiler_params=pltpu.CompilerParams(dimension_semantics=("parallel",)),
    )(x1_col, *params)


# ----------------------------------------------------------------------------
# LocalEncoder parameter construction (channels-last weight layouts)
# ----------------------------------------------------------------------------
def build_local_encoder_params(key, topology, vae_layer=2, vae_grow=(2, 2),
                               kernel_size=4, skeleton_dist=2, conv_dtype=jnp.bfloat16):
    channel_base = [6]                                             # args.channel_base = 6
    for i in range(vae_layer):
        channel_base.append(channel_base[-1] * vae_grow[i])

    topologies = [list(topology)]
    edge_num = [len(topology)]
    layers = []
    for i in range(vae_layer):
        neighbour_list = find_neighbor(topologies[i], skeleton_dist)
        in_ch = channel_base[i] * edge_num[i]
        out_ch = channel_base[i + 1] * edge_num[i]
        last_pool = (i == vae_layer - 1)
        cpe = out_ch // len(neighbour_list)
        pool_w, new_edges, pooling_list = skeleton_pool(topologies[i], cpe, last_pool)

        mask_res = skeleton_conv_mask(neighbour_list, in_ch, out_ch, edge_num[i], kernel_size)
        mask_sc = skeleton_conv_mask(neighbour_list, in_ch, out_ch, edge_num[i], 1)

        # Deterministic synthetic init (module's kaiming-per-block init replaced);
        # skeleton masks are baked into the weights (frozen inference).
        key, k1, k2, k3, k4 = jax.random.split(key, 5)
        w_res = jax.random.normal(k1, (out_ch, in_ch, kernel_size), jnp.float32) * 0.05
        w_res = jnp.transpose(w_res * mask_res, (2, 1, 0))         # (K, Cin, Cout)
        b_res = jax.random.normal(k2, (1, out_ch), jnp.float32) * 0.05
        w_sc = jax.random.normal(k3, (out_ch, in_ch, 1), jnp.float32) * 0.05
        w_sc = jnp.transpose((w_sc * mask_sc)[:, :, 0], (1, 0))    # (Cin, Cout)
        b_sc = jax.random.normal(k4, (1, out_ch), jnp.float32) * 0.05
        gamma = jnp.ones((1, out_ch), jnp.float32)                 # GroupNorm affine defaults
        beta = jnp.zeros((1, out_ch), jnp.float32)

        # TODO(synk): GroupNorm(10, out_channels) follows the NeMF SkeletonResidual
        # reference; the provided LocalEncoder source does not pin the group count.
        num_groups = 10
        assert out_ch % num_groups == 0
        cg = out_ch // num_groups
        gid = np.arange(out_ch) // cg
        grp_reduce = (gid[:, None] == np.arange(num_groups)[None, :]).astype(np.float32)
        grp_scatter = grp_reduce.T.copy()

        if len(pooling_list) == edge_num[i]:
            # SkeletonResidual skips the pool when it does not reduce.
            pool_w = np.eye(out_ch, dtype=np.float32)
        pool_kl = jnp.asarray(pool_w).T                            # (Cout, Cpool) channels-last

        layers.append(dict(
            w_res=w_res.astype(conv_dtype), b_res=b_res,
            w_sc=w_sc.astype(conv_dtype), b_sc=b_sc,
            gamma=gamma, beta=beta,
            grp_reduce=jnp.asarray(grp_reduce), grp_scatter=jnp.asarray(grp_scatter),
            pool=pool_kl, num_groups=num_groups,
            in_ch=in_ch, out_ch=out_ch,
        ))
        topologies.append(list(new_edges))
        edge_num.append(len(new_edges))
    return layers


# ----------------------------------------------------------------------------
# Pure-JAX reference (straightforward re-implementation of the module, f32)
# ----------------------------------------------------------------------------
def _reference_forward(x, layers):
    h = x.astype(jnp.float32)                                      # (B, T, C)
    for p in layers:
        w_res = p['w_res'].astype(jnp.float32)                     # (K, Cin, Cout)
        w_sc = p['w_sc'].astype(jnp.float32)                       # (Cin, Cout)
        K = w_res.shape[0]
        B, T, _ = h.shape
        cout = w_res.shape[-1]
        hp = jnp.pad(h, ((0, 0), (1, 1), (0, 0)))
        t_out = (T + 2 - K) // 2 + 1
        a = jnp.stack(
            [sum(hp[:, 2 * t + k, :] @ w_res[k] for k in range(K)) for t in range(t_out)],
            axis=1) + p['b_res'][None]
        g = p['num_groups']
        cg = cout // g
        ag = a.reshape(B, t_out, g, cg)
        mean = ag.mean(axis=(1, 3), keepdims=True)
        var = ((ag - mean) ** 2).mean(axis=(1, 3), keepdims=True)
        y = ((ag - mean) * jax.lax.rsqrt(var + 1e-5)).reshape(B, t_out, cout)
        y = y * p['gamma'][None] + p['beta'][None]
        z = jnp.einsum('btc,cd->btd', h[:, ::2, :][:, :t_out], w_sc) + p['b_sc'][None]
        h = jnp.tanh(jnp.einsum('btc,cp->btp', y + z, p['pool']))
    return h


# ----------------------------------------------------------------------------
if __name__ == "__main__":
    # Synthetic skeleton: root joint 0 with two kinematic chains of 10 edges each
    # -> 20 edges, 21 joints.  channel_base=6  =>  C_in = 6*20 = 120.
    edges = [(0, 1)] + [(j, j + 1) for j in range(1, 10)] \
          + [(0, 11)] + [(j, j + 1) for j in range(11, 20)]
    assert len(edges) == 20

    key = jax.random.PRNGKey(0)
    key, pkey, xkey = jax.random.split(key, 3)
    layers = build_local_encoder_params(pkey, edges, vae_layer=2, vae_grow=(2, 2))

    B, T = 2, 16
    cin = 6 * len(edges)                                           # 120
    x = jax.random.normal(xkey, (B, T, cin), jnp.float32)

    out = jax.block_until_ready(local_encoder_forward(x, layers))

    # Two stride-2 layers: T 16 -> 8 -> 4; final channels = 2 pooled chains * 24 = 48.
    assert out.shape == (B, T // 4, 48), out.shape
    assert bool(jnp.all(jnp.isfinite(out)))

    ref = _reference_forward(x, layers)
    max_err = float(jnp.max(jnp.abs(out - ref)))
    assert max_err < 0.1, f"kernel deviates from reference: max_err={max_err}"

    print("KERNEL_OK")
</pallas_src>

<mosaic_0001>
module attributes {stable_mosaic.version = 11 : i64} {
  func.func @_fused_local_encoder_kernel(%arg0: i32, %arg1: memref<1x8x480xbf16, #tpu.memory_space<vmem>>, %arg2: memref<480x240xbf16, #tpu.memory_space<vmem>>, %arg3: memref<1x240xf32, #tpu.memory_space<vmem>>, %arg4: memref<1x240xf32, #tpu.memory_space<vmem>>, %arg5: memref<1x240xf32, #tpu.memory_space<vmem>>, %arg6: memref<120x240xbf16, #tpu.memory_space<vmem>>, %arg7: memref<1x240xf32, #tpu.memory_space<vmem>>, %arg8: memref<240x10xf32, #tpu.memory_space<vmem>>, %arg9: memref<10x240xf32, #tpu.memory_space<vmem>>, %arg10: memref<240x120xf32, #tpu.memory_space<vmem>>, %arg11: memref<4x120x240xbf16, #tpu.memory_space<vmem>>, %arg12: memref<1x240xf32, #tpu.memory_space<vmem>>, %arg13: memref<1x240xf32, #tpu.memory_space<vmem>>, %arg14: memref<1x240xf32, #tpu.memory_space<vmem>>, %arg15: memref<120x240xbf16, #tpu.memory_space<vmem>>, %arg16: memref<1x240xf32, #tpu.memory_space<vmem>>, %arg17: memref<240x10xf32, #tpu.memory_space<vmem>>, %arg18: memref<10x240xf32, #tpu.memory_space<vmem>>, %arg19: memref<240x48xf32, #tpu.memory_space<vmem>>, %arg20: memref<1x4x48xf32, #tpu.memory_space<vmem>>) attributes {dimension_semantics = [#tpu.dimension_semantics<parallel>], iteration_bounds = array<i64: 2>, scalar_prefetch = 0 : i64, scratch_operands = 0 : i64, tpu.core_type = #tpu.core_type<tc>, window_params = [{transform_indices = @transform_0, window_bounds = array<i64: 1, 8, 480>}, {pipeline_mode = #tpu.pipeline_mode<synchronous>, transform_indices = @transform_1, window_bounds = array<i64: 480, 240>}, {pipeline_mode = #tpu.pipeline_mode<synchronous>, transform_indices = @transform_2, window_bounds = array<i64: 1, 240>}, {pipeline_mode = #tpu.pipeline_mode<synchronous>, transform_indices = @transform_3, window_bounds = array<i64: 1, 240>}, {pipeline_mode = #tpu.pipeline_mode<synchronous>, transform_indices = @transform_4, window_bounds = array<i64: 1, 240>}, {pipeline_mode = #tpu.pipeline_mode<synchronous>, transform_indices = @transform_5, window_bounds = array<i64: 120, 240>}, {pipeline_mode = #tpu.pipeline_mode<synchronous>, transform_indices = @transform_6, window_bounds = array<i64: 1, 240>}, {pipeline_mode = #tpu.pipeline_mode<synchronous>, transform_indices = @transform_7, window_bounds = array<i64: 240, 10>}, {pipeline_mode = #tpu.pipeline_mode<synchronous>, transform_indices = @transform_8, window_bounds = array<i64: 10, 240>}, {pipeline_mode = #tpu.pipeline_mode<synchronous>, transform_indices = @transform_9, window_bounds = array<i64: 240, 120>}, {pipeline_mode = #tpu.pipeline_mode<synchronous>, transform_indices = @transform_10, window_bounds = array<i64: 4, 120, 240>}, {pipeline_mode = #tpu.pipeline_mode<synchronous>, transform_indices = @transform_11, window_bounds = array<i64: 1, 240>}, {pipeline_mode = #tpu.pipeline_mode<synchronous>, transform_indices = @transform_12, window_bounds = array<i64: 1, 240>}, {pipeline_mode = #tpu.pipeline_mode<synchronous>, transform_indices = @transform_13, window_bounds = array<i64: 1, 240>}, {pipeline_mode = #tpu.pipeline_mode<synchronous>, transform_indices = @transform_14, window_bounds = array<i64: 120, 240>}, {pipeline_mode = #tpu.pipeline_mode<synchronous>, transform_indices = @transform_15, window_bounds = array<i64: 1, 240>}, {pipeline_mode = #tpu.pipeline_mode<synchronous>, transform_indices = @transform_16, window_bounds = array<i64: 240, 10>}, {pipeline_mode = #tpu.pipeline_mode<synchronous>, transform_indices = @transform_17, window_bounds = array<i64: 10, 240>}, {pipeline_mode = #tpu.pipeline_mode<synchronous>, transform_indices = @transform_18, window_bounds = array<i64: 240, 48>}, {transform_indices = @transform_19, window_bounds = array<i64: 1, 4, 48>}]} {
    %c0 = arith.constant 0 : index
    %c0_0 = arith.constant 0 : index
    %c0_1 = arith.constant 0 : index
    %0 = vector.load %arg1[%c0, %c0_0, %c0_1] : memref<1x8x480xbf16, #tpu.memory_space<vmem>>, vector<1x8x480xbf16>
    %1 = vector.shape_cast %0 : vector<1x8x480xbf16> to vector<8x480xbf16>
    %c0_2 = arith.constant 0 : index
    %c0_3 = arith.constant 0 : index
    %2 = vector.load %arg2[%c0_2, %c0_3] : memref<480x240xbf16, #tpu.memory_space<vmem>>, vector<480x240xbf16>
    %cst = arith.constant dense<0.000000e+00> : vector<8x240xf32>
    %3 = tpu.matmul %1, %2, %cst {dimension_numbers = #tpu.dot_dimension_numbers<[1], [0], [0], [1], [0, 0, 1, 1], [], []>} : vector<8x480xbf16>, vector<480x240xbf16>, vector<8x240xf32> -> vector<8x240xf32>
    %c0_4 = arith.constant 0 : index
    %c0_5 = arith.constant 0 : index
    %4 = vector.load %arg3[%c0_4, %c0_5] : memref<1x240xf32, #tpu.memory_space<vmem>>, vector<1x240xf32>
    %5 = vector.broadcast %4 : vector<1x240xf32> to vector<8x240xf32>
    %6 = arith.addf %3, %5 : vector<8x240xf32>
    %cst_6 = arith.constant dense<0.000000e+00> : vector<240xf32>
    %7 = vector.multi_reduction <add>, %6, %cst_6 [0] : vector<8x240xf32> to vector<240xf32>
    %8 = vector.shape_cast %7 : vector<240xf32> to vector<1x240xf32>
    %9 = arith.mulf %6, %6 : vector<8x240xf32>
    %cst_7 = arith.constant dense<0.000000e+00> : vector<240xf32>
    %10 = vector.multi_reduction <add>, %9, %cst_7 [0] : vector<8x240xf32> to vector<240xf32>
    %11 = vector.shape_cast %10 : vector<240xf32> to vector<1x240xf32>
    %12 = tpu.concatenate %8, %11 in 0 : vector<1x240xf32>, vector<1x240xf32> -> vector<2x240xf32>
    %c0_8 = arith.constant 0 : index
    %c0_9 = arith.constant 0 : index
    %13 = vector.load %arg8[%c0_8, %c0_9] : memref<240x10xf32, #tpu.memory_space<vmem>>, vector<240x10xf32>
    %cst_10 = arith.constant dense<0.000000e+00> : vector<2x10xf32>
    %14 = tpu.matmul %12, %13, %cst_10 {dimension_numbers = #tpu.dot_dimension_numbers<[1], [0], [0], [1], [0, 0, 1, 1], [], []>} : vector<2x240xf32>, vector<240x10xf32>, vector<2x10xf32> -> vector<2x10xf32>
    %cst_11 = arith.constant 0.00520833349 : f32
    %15 = vector.broadcast %cst_11 : f32 to vector<2x10xf32>
    %16 = arith.mulf %14, %15 : vector<2x10xf32>
    %17 = vector.extract_strided_slice %16 {offsets = [0, 0], sizes = [1, 10], strides = [1, 1]} : vector<2x10xf32> to vector<1x10xf32>
    %18 = vector.extract_strided_slice %16 {offsets = [1, 0], sizes = [1, 10], strides = [1, 1]} : vector<2x10xf32> to vector<1x10xf32>
    %19 = arith.mulf %17, %17 : vector<1x10xf32>
    %20 = arith.subf %18, %19 : vector<1x10xf32>
    %cst_12 = arith.constant 9.99999974E-6 : f32
    %21 = vector.broadcast %cst_12 : f32 to vector<1x10xf32>
    %22 = arith.addf %20, %21 : vector<1x10xf32>
    %23 = math.rsqrt %22 : vector<1x10xf32>
    %24 = tpu.concatenate %17, %23 in 0 : vector<1x10xf32>, vector<1x10xf32> -> vector<2x10xf32>
    %c0_13 = arith.constant 0 : index
    %c0_14 = arith.constant 0 : index
    %25 = vector.load %arg9[%c0_13, %c0_14] : memref<10x240xf32, #tpu.memory_space<vmem>>, vector<10x240xf32>
    %cst_15 = arith.constant dense<0.000000e+00> : vector<2x240xf32>
    %26 = tpu.matmul %24, %25, %cst_15 {dimension_numbers = #tpu.dot_dimension_numbers<[1], [0], [0], [1], [0, 0, 1, 1], [], []>} : vector<2x10xf32>, vector<10x240xf32>, vector<2x240xf32> -> vector<2x240xf32>
    %27 = vector.extract_strided_slice %26 {offsets = [0, 0], sizes = [1, 240], strides = [1, 1]} : vector<2x240xf32> to vector<1x240xf32>
    %28 = vector.broadcast %27 : vector<1x240xf32> to vector<8x240xf32>
    %29 = arith.subf %6, %28 : vector<8x240xf32>
    %30 = vector.extract_strided_slice %26 {offsets = [1, 0], sizes = [1, 240], strides = [1, 1]} : vector<2x240xf32> to vector<1x240xf32>
    %31 = vector.broadcast %30 : vector<1x240xf32> to vector<8x240xf32>
    %32 = arith.mulf %29, %31 : vector<8x240xf32>
    %c0_16 = arith.constant 0 : index
    %c0_17 = arith.constant 0 : index
    %33 = vector.load %arg4[%c0_16, %c0_17] : memref<1x240xf32, #tpu.memory_space<vmem>>, vector<1x240xf32>
    %34 = vector.broadcast %33 : vector<1x240xf32> to vector<8x240xf32>
    %35 = arith.mulf %32, %34 : vector<8x240xf32>
    %c0_18 = arith.constant 0 : index
    %c0_19 = arith.constant 0 : index
    %36 = vector.load %arg5[%c0_18, %c0_19] : memref<1x240xf32, #tpu.memory_space<vmem>>, vector<1x240xf32>
    %37 = vector.broadcast %36 : vector<1x240xf32> to vector<8x240xf32>
    %38 = arith.addf %35, %37 : vector<8x240xf32>
    %39 = vector.extract_strided_slice %1 {offsets = [0, 120], sizes = [8, 120], strides = [1, 1]} : vector<8x480xbf16> to vector<8x120xbf16>
    %c0_20 = arith.constant 0 : index
    %c0_21 = arith.constant 0 : index
    %40 = vector.load %arg6[%c0_20, %c0_21] : memref<120x240xbf16, #tpu.memory_space<vmem>>, vector<120x240xbf16>
    %cst_22 = arith.constant dense<0.000000e+00> : vector<8x240xf32>
    %41 = tpu.matmul %39, %40, %cst_22 {dimension_numbers = #tpu.dot_dimension_numbers<[1], [0], [0], [1], [0, 0, 1, 1], [], []>} : vector<8x120xbf16>, vector<120x240xbf16>, vector<8x240xf32> -> vector<8x240xf32>
    %c0_23 = arith.constant 0 : index
    %c0_24 = arith.constant 0 : index
    %42 = vector.load %arg7[%c0_23, %c0_24] : memref<1x240xf32, #tpu.memory_space<vmem>>, vector<1x240xf32>
    %43 = vector.broadcast %42 : vector<1x240xf32> to vector<8x240xf32>
    %44 = arith.addf %41, %43 : vector<8x240xf32>
    %45 = arith.addf %38, %44 : vector<8x240xf32>
    %c0_25 = arith.constant 0 : index
    %c0_26 = arith.constant 0 : index
    %46 = vector.load %arg10[%c0_25, %c0_26] : memref<240x120xf32, #tpu.memory_space<vmem>>, vector<240x120xf32>
    %cst_27 = arith.constant dense<0.000000e+00> : vector<8x120xf32>
    %47 = tpu.matmul %45, %46, %cst_27 {dimension_numbers = #tpu.dot_dimension_numbers<[1], [0], [0], [1], [0, 0, 1, 1], [], []>} : vector<8x240xf32>, vector<240x120xf32>, vector<8x120xf32> -> vector<8x120xf32>
    %48 = math.tanh %47 : vector<8x120xf32>
    %49 = arith.truncf %48 : vector<8x120xf32> to vector<8x120xbf16>
    %50 = vector.extract_strided_slice %49 {offsets = [0, 0], sizes = [4, 120], strides = [1, 1]} : vector<8x120xbf16> to vector<4x120xbf16>
    %51 = vector.extract_strided_slice %49 {offsets = [4, 0], sizes = [4, 120], strides = [1, 1]} : vector<8x120xbf16> to vector<4x120xbf16>
    %cst_28 = arith.constant 0.000000e+00 : bf16
    %52 = vector.broadcast %cst_28 : bf16 to vector<1x120xbf16>
    %53 = vector.extract_strided_slice %51 {offsets = [0, 0], sizes = [3, 120], strides = [1, 1]} : vector<4x120xbf16> to vector<3x120xbf16>
    %54 = tpu.concatenate %52, %53 in 0 : vector<1x120xbf16>, vector<3x120xbf16> -> vector<4x120xbf16>
    %55 = vector.extract_strided_slice %50 {offsets = [1, 0], sizes = [3, 120], strides = [1, 1]} : vector<4x120xbf16> to vector<3x120xbf16>
    %56 = tpu.concatenate %55, %52 in 0 : vector<3x120xbf16>, vector<1x120xbf16> -> vector<4x120xbf16>
    %c0_29 = arith.constant 0 : index
    %c0_30 = arith.constant 0 : index
    %c0_31 = arith.constant 0 : index
    %57 = vector.load %arg11[%c0_29, %c0_30, %c0_31] : memref<4x120x240xbf16, #tpu.memory_space<vmem>>, vector<4x120x240xbf16>
    %58 = vector.extract_strided_slice %57 {offsets = [0, 0, 0], sizes = [1, 120, 240], strides = [1, 1, 1]} : vector<4x120x240xbf16> to vector<1x120x240xbf16>
    %59 = vector.shape_cast %58 : vector<1x120x240xbf16> to vector<120x240xbf16>
    %cst_32 = arith.constant dense<0.000000e+00> : vector<4x240xf32>
    %60 = tpu.matmul %54, %59, %cst_32 {dimension_numbers = #tpu.dot_dimension_numbers<[1], [0], [0], [1], [0, 0, 1, 1], [], []>} : vector<4x120xbf16>, vector<120x240xbf16>, vector<4x240xf32> -> vector<4x240xf32>
    %61 = vector.extract_strided_slice %57 {offsets = [1, 0, 0], sizes = [1, 120, 240], strides = [1, 1, 1]} : vector<4x120x240xbf16> to vector<1x120x240xbf16>
    %62 = vector.shape_cast %61 : vector<1x120x240xbf16> to vector<120x240xbf16>
    %cst_33 = arith.constant dense<0.000000e+00> : vector<4x240xf32>
    %63 = tpu.matmul %50, %62, %cst_33 {dimension_numbers = #tpu.dot_dimension_numbers<[1], [0], [0], [1], [0, 0, 1, 1], [], []>} : vector<4x120xbf16>, vector<120x240xbf16>, vector<4x240xf32> -> vector<4x240xf32>
    %64 = arith.addf %60, %63 : vector<4x240xf32>
    %65 = vector.extract_strided_slice %57 {offsets = [2, 0, 0], sizes = [1, 120, 240], strides = [1, 1, 1]} : vector<4x120x240xbf16> to vector<1x120x240xbf16>
    %66 = vector.shape_cast %65 : vector<1x120x240xbf16> to vector<120x240xbf16>
    %cst_34 = arith.constant dense<0.000000e+00> : vector<4x240xf32>
    %67 = tpu.matmul %51, %66, %cst_34 {dimension_numbers = #tpu.dot_dimension_numbers<[1], [0], [0], [1], [0, 0, 1, 1], [], []>} : vector<4x120xbf16>, vector<120x240xbf16>, vector<4x240xf32> -> vector<4x240xf32>
    %68 = arith.addf %64, %67 : vector<4x240xf32>
    %69 = vector.extract_strided_slice %57 {offsets = [3, 0, 0], sizes = [1, 120, 240], strides = [1, 1, 1]} : vector<4x120x240xbf16> to vector<1x120x240xbf16>
    %70 = vector.shape_cast %69 : vector<1x120x240xbf16> to vector<120x240xbf16>
    %cst_35 = arith.constant dense<0.000000e+00> : vector<4x240xf32>
    %71 = tpu.matmul %56, %70, %cst_35 {dimension_numbers = #tpu.dot_dimension_numbers<[1], [0], [0], [1], [0, 0, 1, 1], [], []>} : vector<4x120xbf16>, vector<120x240xbf16>, vector<4x240xf32> -> vector<4x240xf32>
    %72 = arith.addf %68, %71 : vector<4x240xf32>
    %c0_36 = arith.constant 0 : index
    %c0_37 = arith.constant 0 : index
    %73 = vector.load %arg12[%c0_36, %c0_37] : memref<1x240xf32, #tpu.memory_space<vmem>>, vector<1x240xf32>
    %74 = vector.broadcast %73 : vector<1x240xf32> to vector<4x240xf32>
    %75 = arith.addf %72, %74 : vector<4x240xf32>
    %cst_38 = arith.constant dense<0.000000e+00> : vector<240xf32>
    %76 = vector.multi_reduction <add>, %75, %cst_38 [0] : vector<4x240xf32> to vector<240xf32>
    %77 = vector.shape_cast %76 : vector<240xf32> to vector<1x240xf32>
    %78 = arith.mulf %75, %75 : vector<4x240xf32>
    %cst_39 = arith.constant dense<0.000000e+00> : vector<240xf32>
    %79 = vector.multi_reduction <add>, %78, %cst_39 [0] : vector<4x240xf32> to vector<240xf32>
    %80 = vector.shape_cast %79 : vector<240xf32> to vector<1x240xf32>
    %81 = tpu.concatenate %77, %80 in 0 : vector<1x240xf32>, vector<1x240xf32> -> vector<2x240xf32>
    %c0_40 = arith.constant 0 : index
    %c0_41 = arith.constant 0 : index
    %82 = vector.load %arg17[%c0_40, %c0_41] : memref<240x10xf32, #tpu.memory_space<vmem>>, vector<240x10xf32>
    %cst_42 = arith.constant dense<0.000000e+00> : vector<2x10xf32>
    %83 = tpu.matmul %81, %82, %cst_42 {dimension_numbers = #tpu.dot_dimension_numbers<[1], [0], [0], [1], [0, 0, 1, 1], [], []>} : vector<2x240xf32>, vector<240x10xf32>, vector<2x10xf32> -> vector<2x10xf32>
    %cst_43 = arith.constant 0.010416667 : f32
    %84 = vector.broadcast %cst_43 : f32 to vector<2x10xf32>
    %85 = arith.mulf %83, %84 : vector<2x10xf32>
    %86 = vector.extract_strided_slice %85 {offsets = [0, 0], sizes = [1, 10], strides = [1, 1]} : vector<2x10xf32> to vector<1x10xf32>
    %87 = vector.extract_strided_slice %85 {offsets = [1, 0], sizes = [1, 10], strides = [1, 1]} : vector<2x10xf32> to vector<1x10xf32>
    %88 = arith.mulf %86, %86 : vector<1x10xf32>
    %89 = arith.subf %87, %88 : vector<1x10xf32>
    %cst_44 = arith.constant 9.99999974E-6 : f32
    %90 = vector.broadcast %cst_44 : f32 to vector<1x10xf32>
    %91 = arith.addf %89, %90 : vector<1x10xf32>
    %92 = math.rsqrt %91 : vector<1x10xf32>
    %93 = tpu.concatenate %86, %92 in 0 : vector<1x10xf32>, vector<1x10xf32> -> vector<2x10xf32>
    %c0_45 = arith.constant 0 : index
    %c0_46 = arith.constant 0 : index
    %94 = vector.load %arg18[%c0_45, %c0_46] : memref<10x240xf32, #tpu.memory_space<vmem>>, vector<10x240xf32>
    %cst_47 = arith.constant dense<0.000000e+00> : vector<2x240xf32>
    %95 = tpu.matmul %93, %94, %cst_47 {dimension_numbers = #tpu.dot_dimension_numbers<[1], [0], [0], [1], [0, 0, 1, 1], [], []>} : vector<2x10xf32>, vector<10x240xf32>, vector<2x240xf32> -> vector<2x240xf32>
    %96 = vector.extract_strided_slice %95 {offsets = [0, 0], sizes = [1, 240], strides = [1, 1]} : vector<2x240xf32> to vector<1x240xf32>
    %97 = vector.broadcast %96 : vector<1x240xf32> to vector<4x240xf32>
    %98 = arith.subf %75, %97 : vector<4x240xf32>
    %99 = vector.extract_strided_slice %95 {offsets = [1, 0], sizes = [1, 240], strides = [1, 1]} : vector<2x240xf32> to vector<1x240xf32>
    %100 = vector.broadcast %99 : vector<1x240xf32> to vector<4x240xf32>
    %101 = arith.mulf %98, %100 : vector<4x240xf32>
    %c0_48 = arith.constant 0 : index
    %c0_49 = arith.constant 0 : index
    %102 = vector.load %arg13[%c0_48, %c0_49] : memref<1x240xf32, #tpu.memory_space<vmem>>, vector<1x240xf32>
    %103 = vector.broadcast %102 : vector<1x240xf32> to vector<4x240xf32>
    %104 = arith.mulf %101, %103 : vector<4x240xf32>
    %c0_50 = arith.constant 0 : index
    %c0_51 = arith.constant 0 : index
    %105 = vector.load %arg14[%c0_50, %c0_51] : memref<1x240xf32, #tpu.memory_space<vmem>>, vector<1x240xf32>
    %106 = vector.broadcast %105 : vector<1x240xf32> to vector<4x240xf32>
    %107 = arith.addf %104, %106 : vector<4x240xf32>
    %c0_52 = arith.constant 0 : index
    %c0_53 = arith.constant 0 : index
    %108 = vector.load %arg15[%c0_52, %c0_53] : memref<120x240xbf16, #tpu.memory_space<vmem>>, vector<120x240xbf16>
    %cst_54 = arith.constant dense<0.000000e+00> : vector<4x240xf32>
    %109 = tpu.matmul %50, %108, %cst_54 {dimension_numbers = #tpu.dot_dimension_numbers<[1], [0], [0], [1], [0, 0, 1, 1], [], []>} : vector<4x120xbf16>, vector<120x240xbf16>, vector<4x240xf32> -> vector<4x240xf32>
    %c0_55 = arith.constant 0 : index
    %c0_56 = arith.constant 0 : index
    %110 = vector.load %arg16[%c0_55, %c0_56] : memref<1x240xf32, #tpu.memory_space<vmem>>, vector<1x240xf32>
    %111 = vector.broadcast %110 : vector<1x240xf32> to vector<4x240xf32>
    %112 = arith.addf %109, %111 : vector<4x240xf32>
    %113 = arith.addf %107, %112 : vector<4x240xf32>
    %c0_57 = arith.constant 0 : index
    %c0_58 = arith.constant 0 : index
    %114 = vector.load %arg19[%c0_57, %c0_58] : memref<240x48xf32, #tpu.memory_space<vmem>>, vector<240x48xf32>
    %cst_59 = arith.constant dense<0.000000e+00> : vector<4x48xf32>
    %115 = tpu.matmul %113, %114, %cst_59 {dimension_numbers = #tpu.dot_dimension_numbers<[1], [0], [0], [1], [0, 0, 1, 1], [], []>} : vector<4x240xf32>, vector<240x48xf32>, vector<4x48xf32> -> vector<4x48xf32>
    %116 = math.tanh %115 : vector<4x48xf32>
    %c0_60 = arith.constant 0 : index
    %c0_61 = arith.constant 0 : index
    %c0_62 = arith.constant 0 : index
    %117 = vector.load %arg20[%c0_60, %c0_61, %c0_62] : memref<1x4x48xf32, #tpu.memory_space<vmem>>, vector<1x4x48xf32>
    %118 = vector.shape_cast %117 : vector<1x4x48xf32> to vector<4x48xf32>
    %119 = vector.shape_cast %116 : vector<4x48xf32> to vector<1x4x48xf32>
    tpu.vector_store %arg20[%c0_60, %c0_61, %c0_62], %119 {strides = array<i32>} : memref<1x4x48xf32, #tpu.memory_space<vmem>>, vector<1x4x48xf32>,
    return
  }
  func.func @transform_0(%arg0: i32) -> (i32, i32, i32) {
    %c0_i32 = arith.constant 0 : i32
    %c0_i32_0 = arith.constant 0 : i32
    %c0_i32_1 = arith.constant 0 : i32
    return %arg0, %c0_i32, %c0_i32_0 : i32, i32, i32
  }
  func.func @transform_1(%arg0: i32) -> (i32, i32) {
    %c0_i32 = arith.constant 0 : i32
    %c0_i32_0 = arith.constant 0 : i32
    %c0_i32_1 = arith.constant 0 : i32
    return %c0_i32, %c0_i32_0 : i32, i32
  }
  func.func @transform_2(%arg0: i32) -> (i32, i32) {
    %c0_i32 = arith.constant 0 : i32
    %c0_i32_0 = arith.constant 0 : i32
    %c0_i32_1 = arith.constant 0 : i32
    return %c0_i32, %c0_i32_0 : i32, i32
  }
  func.func @transform_3(%arg0: i32) -> (i32, i32) {
    %c0_i32 = arith.constant 0 : i32
    %c0_i32_0 = arith.constant 0 : i32
    %c0_i32_1 = arith.constant 0 : i32
    return %c0_i32, %c0_i32_0 : i32, i32
  }
  func.func @transform_4(%arg0: i32) -> (i32, i32) {
    %c0_i32 = arith.constant 0 : i32
    %c0_i32_0 = arith.constant 0 : i32
    %c0_i32_1 = arith.constant 0 : i32
    return %c0_i32, %c0_i32_0 : i32, i32
  }
  func.func @transform_5(%arg0: i32) -> (i32, i32) {
    %c0_i32 = arith.constant 0 : i32
    %c0_i32_0 = arith.constant 0 : i32
    %c0_i32_1 = arith.constant 0 : i32
    return %c0_i32, %c0_i32_0 : i32, i32
  }
  func.func @transform_6(%arg0: i32) -> (i32, i32) {
    %c0_i32 = arith.constant 0 : i32
    %c0_i32_0 = arith.constant 0 : i32
    %c0_i32_1 = arith.constant 0 : i32
    return %c0_i32, %c0_i32_0 : i32, i32
  }
  func.func @transform_7(%arg0: i32) -> (i32, i32) {
    %c0_i32 = arith.constant 0 : i32
    %c0_i32_0 = arith.constant 0 : i32
    %c0_i32_1 = arith.constant 0 : i32
    return %c0_i32, %c0_i32_0 : i32, i32
  }
  func.func @transform_8(%arg0: i32) -> (i32, i32) {
    %c0_i32 = arith.constant 0 : i32
    %c0_i32_0 = arith.constant 0 : i32
    %c0_i32_1 = arith.constant 0 : i32
    return %c0_i32, %c0_i32_0 : i32, i32
  }
  func.func @transform_9(%arg0: i32) -> (i32, i32) {
    %c0_i32 = arith.constant 0 : i32
    %c0_i32_0 = arith.constant 0 : i32
    %c0_i32_1 = arith.constant 0 : i32
    return %c0_i32, %c0_i32_0 : i32, i32
  }
  func.func @transform_10(%arg0: i32) -> (i32, i32, i32) {
    %c0_i32 = arith.constant 0 : i32
    %c0_i32_0 = arith.constant 0 : i32
    %c0_i32_1 = arith.constant 0 : i32
    %c0_i32_2 = arith.constant 0 : i32
    return %c0_i32, %c0_i32_0, %c0_i32_1 : i32, i32, i32
  }
  func.func @transform_11(%arg0: i32) -> (i32, i32) {
    %c0_i32 = arith.constant 0 : i32
    %c0_i32_0 = arith.constant 0 : i32
    %c0_i32_1 = arith.constant 0 : i32
    return %c0_i32, %c0_i32_0 : i32, i32
  }
  func.func @transform_12(%arg0: i32) -> (i32, i32) {
    %c0_i32 = arith.constant 0 : i32
    %c0_i32_0 = arith.constant 0 : i32
    %c0_i32_1 = arith.constant 0 : i32
    return %c0_i32, %c0_i32_0 : i32, i32
  }
  func.func @transform_13(%arg0: i32) -> (i32, i32) {
    %c0_i32 = arith.constant 0 : i32
    %c0_i32_0 = arith.constant 0 : i32
    %c0_i32_1 = arith.constant 0 : i32
    return %c0_i32, %c0_i32_0 : i32, i32
  }
  func.func @transform_14(%arg0: i32) -> (i32, i32) {
    %c0_i32 = arith.constant 0 : i32
    %c0_i32_0 = arith.constant 0 : i32
    %c0_i32_1 = arith.constant 0 : i32
    return %c0_i32, %c0_i32_0 : i32, i32
  }
  func.func @transform_15(%arg0: i32) -> (i32, i32) {
    %c0_i32 = arith.constant 0 : i32
    %c0_i32_0 = arith.constant 0 : i32
    %c0_i32_1 = arith.constant 0 : i32
    return %c0_i32, %c0_i32_0 : i32, i32
  }
  func.func @transform_16(%arg0: i32) -> (i32, i32) {
    %c0_i32 = arith.constant 0 : i32
    %c0_i32_0 = arith.constant 0 : i32
    %c0_i32_1 = arith.constant 0 : i32
    return %c0_i32, %c0_i32_0 : i32, i32
  }
  func.func @transform_17(%arg0: i32) -> (i32, i32) {
    %c0_i32 = arith.constant 0 : i32
    %c0_i32_0 = arith.constant 0 : i32
    %c0_i32_1 = arith.constant 0 : i32
    return %c0_i32, %c0_i32_0 : i32, i32
  }
  func.func @transform_18(%arg0: i32) -> (i32, i32) {
    %c0_i32 = arith.constant 0 : i32
    %c0_i32_0 = arith.constant 0 : i32
    %c0_i32_1 = arith.constant 0 : i32
    return %c0_i32, %c0_i32_0 : i32, i32
  }
  func.func @transform_19(%arg0: i32) -> (i32, i32, i32) {
    %c0_i32 = arith.constant 0 : i32
    %c0_i32_0 = arith.constant 0 : i32
    %c0_i32_1 = arith.constant 0 : i32
    return %arg0, %c0_i32, %c0_i32_0 : i32, i32, i32
  }
}

</mosaic_0001>

<bundles_post_ra>
// kernel: tpu_custom_call.1
= control target key start
LH: loop header
LB: loop body
LE: loop exit
PB: predicated region body
PF: predicated region fallthrough
CT: control target
= control target key end

     0   :  { %s5172_s0 = inlined_call_operand.vmem [shape: bf16[2,8,480], index: 0, kind: input, shape index: {}]   ;;  %s5173_s1 = inlined_call_operand.vmem [shape: bf16[480,240], index: 1, kind: input, shape index: {}]   ;;  %s5174_s2 = inlined_call_operand.hbm [shape: f32[1,240], index: 2, kind: input, shape index: {}]   ;;  %s5175_s3 = inlined_call_operand.hbm [shape: f32[1,240], index: 3, kind: input, shape index: {}]   ;;  %s5176_s4 = inlined_call_operand.hbm [shape: f32[1,240], index: 4, kind: input, shape index: {}]   ;;  %s5177_s5 = inlined_call_operand.hbm [shape: bf16[120,240], index: 5, kind: input, shape index: {}]   ;;  %s5178_s6 = inlined_call_operand.hbm [shape: f32[1,240], index: 6, kind: input, shape index: {}]   ;;  %s5179_s7 = inlined_call_operand.vmem [shape: f32[240,10], index: 7, kind: input, shape index: {}]   ;;  %s5180_s8 = inlined_call_operand.hbm [shape: f32[10,240], index: 8, kind: input, shape index: {}]   ;;  %s5181_s9 = inlined_call_operand.vmem [shape: f32[240,120], index: 9, kind: input, shape index: {}]   ;;  %s5182_s10 = inlined_call_operand.hbm [shape: bf16[4,120,240], index: 10, kind: input, shape index: {}]   ;;  %s5183_s11 = inlined_call_operand.vmem [shape: f32[1,240], index: 11, kind: input, shape index: {}]   ;;  %s5184_s12 = inlined_call_operand.vmem [shape: f32[1,240], index: 12, kind: input, shape index: {}]   ;;  %s5185_s13 = inlined_call_operand.vmem [shape: f32[1,240], index: 13, kind: input, shape index: {}]   ;;  %s5186_s14 = inlined_call_operand.hbm [shape: bf16[120,240], index: 14, kind: input, shape index: {}]   ;;  %s5187_s15 = inlined_call_operand.vmem [shape: f32[1,240], index: 15, kind: input, shape index: {}]   ;;  %s5188_s16 = inlined_call_operand.vmem [shape: f32[240,10], index: 16, kind: input, shape index: {}]   ;;  %s5189_s17 = inlined_call_operand.hbm [shape: f32[10,240], index: 17, kind: input, shape index: {}]   ;;  %s5190_s18 = inlined_call_operand.vmem [shape: f32[240,48], index: 18, kind: input, shape index: {}]   ;;  %s5191_s19 = inlined_call_operand.hbm [shape: f32[2,4,48], index: 19, kind: output, shape index: {}]  }
   0x1   :  { %5206 = sst [smem:[#allocation32_spill]] %s5172_s0 }
   0x2   :  { %5207 = sst [smem:[#allocation33_spill]] %s5173_s1 }
   0x3   :  { %5208 = sst [smem:[#allocation34_spill]] %s5174_s2 }
   0x4   :  { %5209 = sst [smem:[#allocation35_spill]] %s5175_s3 }
   0x5   :  { %5210 = sst [smem:[#allocation36_spill]] %s5177_s5 }
   0x6   :  { %5211 = sst [smem:[#allocation37_spill]] %s5180_s8 }
   0x7   :  { %5212 = sst [smem:[#allocation38_spill]] %s5186_s14 }
   0x8   :  { %5213 = sst [smem:[#allocation39_spill]] %s5191_s19 }
   0x9   :  { %24 = vsyncpa [#allocation3], 0 }
   0xa   :  { %25 = vsyncpa [#allocation6], 0 }
   0xb   :  { %26 = vsyncpa [#allocation9], 0 }
   0xc   :  { %27 = vsyncpa [#allocation12], 0 }
   0xd   :  { %28 = vsyncpa [#allocation15], 0 }
   0xe   :  { %29 = vsyncpa [#allocation4], 0 }
   0xf   :  { %31 = vsyncpa [#allocation4 + $0x1], 0  ;;  %s4143_s0 = smov 0   ;;  %s4145_s30 = smov 0  }
  0x10   :  { %s4147_s20 = smov 0   ;;  %s4149_s21 = smov 0  }
  0x11 LB: > { %5214 = sst [smem:[#allocation24_spill]] %s4015_s0  ;;  %s4164_s1 = sadd.s32 4294967295, %s4027_s21   ;;  %s4027_s21 = sphi %s4149_s21, %s5242_s21   ;;  %s4023_s20 = sphi %s4147_s20, %s5245_s20   ;;  %s4019_s30 = sphi %s4145_s30, %s5244_s30   ;;  %s4015_s0 = sphi %s4143_s0, %s5243_s0  }
  0x12   : > { %5215 = sst [smem:[#allocation25_spill]] %s4019_s30  ;;  %s2756_s22 = sadd.s32 4294967294, %s4027_s21  }
  0x13   : > { %5216 = sst [smem:[#allocation26_spill]] %s4023_s20  ;;  %s4168_s2 = sadd.s32 1, %s4027_s21  }
  0x14   : > { %5217 = sst [smem:[#allocation27_spill]] %s4027_s21  ;;  %s448_s23 = sadd.s32 1, %s4023_s20 }
  0x15   : > { %5218 = sst [smem:[#allocation28_spill]] %s4168_s2  ;;  %s445_s24 = ssub.s32 %s4027_s21, %s4168_s2 }
  0x16   : > { %p458_p0 = scmp.ne.s32.totalorder %s4023_s20, %s4019_s30  ;;  %p446_p1 = scmp.eq.s32.totalorder %s445_s24, 0 }
  0x17   : > { %p459_p2 = scmp.eq.s32.totalorder %s4164_s1, 1  ;;  %p464_p3 = scmp.ne.s32.totalorder %s4019_s30, %s4015_s0 }
  0x18   : > { %p465_p4 = scmp.eq.s32.totalorder %s2756_s22, 1  ;;  %p2757_p7 = scmp.ge.s32.totalorder %s4027_s21, 1 }
  0x19   : > { %s4179_s25 = scalar_select %p446_p1, %s4023_s20, %s448_s23  }
  0x1a   : > { %p4181_p5 = por %p459_p2, %p458_p0  ;;  %p4185_p6 = por %p465_p4, %p464_p3 }
  0x1b   : > { %5219 = sst [smem:[#allocation29_spill]] %s4179_s25  ;;  %p472_p8 = scmp.lt.s32.totalorder %s4027_s21, 3 }
  0x1c   : > { %s5220_s3 = scalar_select %p4181_p5, 1, 0 }
  0x1d   : > { %s5222_s26 = scalar_select %p4185_p6, 1, 0 }
  0x1e   : > { %5221 = sst [smem:[#allocation30_spill]] %s5220_s3  ;;  %p3602_p9 = scmp.eq.s32.totalorder %s4164_s1, 0 }
  0x1f   : > { %5223 = sst [smem:[#allocation31_spill]] %s5222_s26  ;;  %p4192_p10 = pnand %p2757_p7, %p472_p8 }
  0x20   : > { %s5225_s22 = sld [smem:[#allocation35_spill]]  ;;  %s4029_s24 = smov [#allocation5]  }
  0x21   : > { %p3570_p11 = pneg %p4192_p10  ;;  %s501_s25 = sshll.u32 %s4029_s24, 4  ;;  %s502_s25 = int_to_ptr.vmem [resolvable:$true] %s501_s25 }
  0x22   : > { %s5226_s5 = sld [smem:[#allocation36_spill]]  ;;  %s4030_s28 = smov [#allocation8]  }
  0x23   : > { %p4206_p12 = pnand %p3602_p9, %p3570_p11  ;;  %s524_s29 = sshll.u32 %s4030_s28, 4  ;;  %s525_s29 = int_to_ptr.vmem [resolvable:$true] %s524_s29 }
  0x24   : > { %s4032_s24 = smov 8   ;;  %s5228_s8 = sld [smem:[#allocation37_spill]] }
  0x25   : > { %s4033_s21 = smov [#allocation11]   ;;  %s5229_s14 = sld [smem:[#allocation38_spill]] }
  0x26   : > { %s499_s23 = sshll.u32 %s5225_s22, 4  ;;  %s5203_s22 = smov 128   ;;  %s500_s23 = int_to_ptr.hbm [resolvable:$true] %s499_s23 }
  0x27   : > { %3576 = dma.hbm_to_vmem [thread:$0]  (!%p4206_p12), %s500_s23, 32, %s502_s25, [#allocation6]  }
  0x28   : > { %s522_s26 = sshll.u32 %s5226_s5, 4  ;;  %s553_s3 = sshll.u32 %s4033_s21, 4  ;;  %s523_s26 = int_to_ptr.hbm [resolvable:$true] %s522_s26  ;;  %s554_s3 = int_to_ptr.vmem [resolvable:$true] %s553_s3 }
  0x29   : > { %3582 = dma.hbm_to_vmem [thread:$0]  (!%p4206_p12), %s523_s26, 1920, %s525_s29, [#allocation9], %s5203_s22, %s5203_s22, %s4032_s24  }
  0x2a   : > { %s551_s5 = sshll.u32 %s5228_s8, 4  ;;  %s5205_s23 = smov 256   ;;  %s552_s5 = int_to_ptr.hbm [resolvable:$true] %s551_s5 }
  0x2b   : > { %s591_s25 = sshll.u32 %s5229_s14, 4  ;;  %s4035_s30 = smov 16   ;;  %s592_s25 = int_to_ptr.hbm [resolvable:$true] %s591_s25 }
  0x2c   : > { %3588 = dma.hbm_to_vmem [thread:$0]  (!%p4206_p12), %s552_s5, 512, %s554_s3, [#allocation12], %s5205_s23, %s5205_s23, %s4035_s30  }
  0x2d   : > { %s4036_s26 = smov [#allocation14]   ;;  %s5230_s22 = sld [smem:[#allocation34_spill]] }
  0x2e   : > { %s593_s29 = sshll.u32 %s4036_s26, 4  ;;  %s5231_s19 = smov 128   ;;  %s594_s29 = int_to_ptr.vmem [resolvable:$true] %s593_s29 }
  0x2f   : > { %3594 = dma.hbm_to_vmem [thread:$0]  (!%p4206_p12), %s592_s25, 1920, %s594_s29, [#allocation15], %s5231_s19, %s5231_s19, %s4032_s24  }
  0x30   : > { %s511_s14 = sshll.u32 %s5176_s4, 4  ;;  %s4037_s5 = smov [#allocation2]   ;;  %s512_s14 = int_to_ptr.hbm [resolvable:$true] %s511_s14 }
  0x31   : > { %s489_s3 = sshll.u32 %s4037_s5, 4  ;;  %s4038_s26 = smov [#allocation7]   ;;  %s490_s3 = int_to_ptr.vmem [resolvable:$true] %s489_s3 }
  0x32   : > { %s537_s23 = sshll.u32 %s5178_s6, 4  ;;  %s568_s29 = sshll.u32 %s5182_s10, 4  ;;  %s538_s23 = int_to_ptr.hbm [resolvable:$true] %s537_s23  ;;  %s569_s29 = int_to_ptr.hbm [resolvable:$true] %s568_s29 }
  0x33   : > { %s487_s21 = sshll.u32 %s5230_s22, 4  ;;  %s513_s22 = sshll.u32 %s4038_s26, 4  ;;  %s488_s21 = int_to_ptr.hbm [resolvable:$true] %s487_s21  ;;  %s514_s22 = int_to_ptr.vmem [resolvable:$true] %s513_s22 }
  0x34   : > { %3573 = dma.hbm_to_vmem [thread:$0]  (!%p4206_p12), %s488_s21, 32, %s490_s3, [#allocation3]  }
  0x35   : > { %3579 = dma.hbm_to_vmem [thread:$0]  (!%p4206_p12), %s512_s14, 32, %s514_s22, [#allocation6]  }
  0x36   : > { %s4039_s28 = smov [#allocation10]   ;;  %s4040_s21 = smov [#allocation13]  }
  0x37   : > { %s539_s5 = sshll.u32 %s4039_s28, 4  ;;  %s570_s3 = sshll.u32 %s4040_s21, 4  ;;  %s540_s5 = int_to_ptr.vmem [resolvable:$true] %s539_s5  ;;  %s571_s3 = int_to_ptr.vmem [resolvable:$true] %s570_s3 }
  0x38   : > { %3585 = dma.hbm_to_vmem [thread:$0]  (!%p4206_p12), %s538_s23, 32, %s540_s5, [#allocation9]  }
  0x39   : > { %s611_s2 = sshll.u32 %s5189_s17, 4  ;;  %s4041_s14 = smov [#allocation16]   ;;  %s612_s2 = int_to_ptr.hbm [resolvable:$true] %s611_s2 }
  0x3a   : > { %3591 = dma.hbm_to_vmem [thread:$0]  (!%p4206_p12), %s569_s29, 7680, %s571_s3, [#allocation12], %s5231_s19, %s5231_s19, %s4032_s24  }
  0x3b   : > { %s613_s22 = sshll.u32 %s4041_s14, 4  ;;  %s5232_s8 = smov 256   ;;  %s614_s22 = int_to_ptr.vmem [resolvable:$true] %s613_s22 }
  0x3c   : > { %3597 = dma.hbm_to_vmem [thread:$0]  (!%p4206_p12), %s612_s2, 512, %s614_s22, [#allocation15], %s5232_s8, %s5232_s8, %s4035_s30  }
  0x3d   : > { %640 = sbr.rel (%p4192_p10) target bundleno = 1360 (0x550), region = 96 }
  0x42   : > { %3990 = dma.done.wait (%p3602_p9), [#allocation3], 32  }
  0x43   : > { %3992 = vsyncadd (%p3602_p9), [#allocation3], 4294967264 }
  0x44   : > { %3994 = dma.done.wait (%p3602_p9), [#allocation6], 64  }
  0x45   : > { %3996 = vsyncadd (%p3602_p9), [#allocation6], 4294967232 }
  0x46   : > { %3998 = dma.done.wait (%p3602_p9), [#allocation9], 1952  }
  0x47   : > { %4000 = vsyncadd (%p3602_p9), [#allocation9], 4294965344 }
  0x48   : > { %4002 = dma.done.wait (%p3602_p9), [#allocation12], 8192  }
  0x49   : > { %4004 = vsyncadd (%p3602_p9), [#allocation12], 4294959104 }
  0x4a   : > { %4006 = dma.done.wait (%p3602_p9), [#allocation15], 2432  }
  0x4b   : > { %4008 = vsyncadd (%p3602_p9), [#allocation15], 4294964864  ;;  %p737_p13 = scmp.lt.s32.totalorder %s4164_s1, 1  ;;  %s5233_s27 = sld [smem:[#allocation33_spill]]  ;;  %vm1124_vm0 = vcmask 785408   ;;  %vm1261_vm1 = vcmask 1040384  }
  0x4c   : > { %s5234_s0 = sld [smem:[#allocation32_spill]]  ;;  %s4042_s23 = smov 8   ;;  %vm1238_vm2 = vcmask 916480   ;;  %vm1363_vm3 = vcmask 1041408   ;;  %vm1540_vm4 = vcmask 1043456   ;;  %vm1359_vm8 = vcmask 80896  }
  0x4d   : > { %s4386_s2 = scalar_select %p737_p13, %s4164_s1, 1  ;;  %vm1459_vm9 = vcmask 64512   ;;  %vm1536_vm10 = vcmask 982016   ;;  %vm1663_vm11 = vsmask.f32 256  ;;  %vm2193_vm15 = vcmask 912384  }
  0x4e   : > { %vm1664_vm12 = vmand %vm1261_vm1, %vm1663_vm11  ;;  %vm1670_vm13 = vsmask.f32 1280  ;;  %s5235_s25 = sld [smem:[#allocation25_spill]] }
  0x4f   : > { %s3387_s14 = sshll.u32 %s4386_s2, 4  ;;  %vm1671_vm14 = vmand %vm1363_vm3, %vm1670_vm13  ;;  %s5236_s21 = sld [smem:[#allocation39_spill]] }
  0x51   : > { %v2839_v0 = vld [vmem:[%s5233_s27 + $0x70] sm:$0xf]  ;;  %v3403_v1 = vld [vmem:[%s5233_s27 + $0x74] sm:$0xf0]  ;;  %v2831_v11 = vld [vmem:[%s5233_s27 + $0x60] sm:$0xf] }
  0x52   : > { %v2903_v2 = vld [vmem:[%s5233_s27 + $0xf0] sm:$0xf]  ;;  %v2840_v3 = vor.u32 %v3403_v1, %v2839_v0  ;;  %v3419_v4 = vld [vmem:[%s5233_s27 + $0xf4] sm:$0xf0]  ;;  %v3401_v13 = vld [vmem:[%s5233_s27 + $0x64] sm:$0xf0]  ;;  %s4440_s30 = scalar_lea.vmem %s5234_s0, %s3387_s14 }
  0x53   : > { %v2967_v5 = vld [vmem:[%s5233_s27 + $0x170] sm:$0xf]  ;;  %v3435_v6 = vld [vmem:[%s5233_s27 + $0x174] sm:$0xf0]  ;;  %v2904_v7 = vor.u32 %v3419_v4, %v2903_v2  ;;  %v2895_v14 = vld [vmem:[%s5233_s27 + $0xe0] sm:$0xf]  ;;  %v2832_v16 = vor.u32 %v3401_v13, %v2831_v11 }
  0x54   : > { %v2968_v8 = vor.u32 %v3435_v6, %v2967_v5  ;;  %v3015_v9 = vld [vmem:[%s5233_s27 + $0x1d0] sm:$0xf]  ;;  %v3447_v10 = vld [vmem:[%s5233_s27 + $0x1d4] sm:$0xf0]  ;;  %1128 = vmatpush.bf16.msra.mxu0 %v2840_v3  ;;  %v3417_v15 = vld [vmem:[%s5233_s27 + $0xe4] sm:$0xf0] }
  0x55   : > { %v3016_v12 = vor.u32 %v3447_v10, %v3015_v9  ;;  %1141 = vmatpush.bf16.msra.mxu1 %v2904_v7  ;;  %v2896_v17 = vor.u32 %v3417_v15, %v2895_v14  ;;  %v2959_v18 = vld [vmem:[%s5233_s27 + $0x160] sm:$0xf]  ;;  %v3433_v19 = vld [vmem:[%s5233_s27 + $0x164] sm:$0xf0]  ;;  %v2823_v23 = vld [vmem:[%s5233_s27 + $0x50] sm:$0xf]  ;;  %s5237_s3 = smov %s5236_s21 }
  0x56   : > { %1154 = vmatpush.bf16.msra.mxu2 %v2968_v8  ;;  %v3007_v20 = vld [vmem:[%s5233_s27 + $0x1c0] sm:$0xf]  ;;  %v2960_v21 = vor.u32 %v3433_v19, %v2959_v18  ;;  %v3445_v22 = vld [vmem:[%s5233_s27 + $0x1c4] sm:$0xf0]  ;;  %v3399_v24 = vld [vmem:[%s5233_s27 + $0x54] sm:$0xf0] }
  0x57   : > { %1169 = vmatpush.bf16.msra.mxu3 %v3016_v12  ;;  %v3008_v25 = vor.u32 %v3445_v22, %v3007_v20  ;;  %v2887_v26 = vld [vmem:[%s5233_s27 + $0xd0] sm:$0xf]  ;;  %v3415_v27 = vld [vmem:[%s5233_s27 + $0xd4] sm:$0xf0]  ;;  %v2824_v29 = vor.u32 %v3399_v24, %v2823_v23  ;;  %v2815_v35 = vld [vmem:[%s5233_s27 + $0x40] sm:$0xf] }
  0x58   : > { %v2951_v28 = vld [vmem:[%s5233_s27 + $0x150] sm:$0xf]  ;;  %1129 = vmatpush.bf16.msra.mxu0 %v2832_v16  ;;  %v3431_v30 = vld [vmem:[%s5233_s27 + $0x154] sm:$0xf0]  ;;  %v2888_v33 = vor.u32 %v3415_v27, %v2887_v26  ;;  %v3397_v36 = vld [vmem:[%s5233_s27 + $0x44] sm:$0xf0] }
  0x59   : > { %v2999_v31 = vld [vmem:[%s5233_s27 + $0x1b0] sm:$0xf]  ;;  %v3443_v32 = vld [vmem:[%s5233_s27 + $0x1b4] sm:$0xf0]  ;;  %1142 = vmatpush.bf16.msra.mxu1 %v2896_v17  ;;  %v2952_v34 = vor.u32 %v3431_v30, %v2951_v28  ;;  %v2879_v37 = vld [vmem:[%s5233_s27 + $0xc0] sm:$0xf]  ;;  %v2816_v44 = vor.u32 %v3397_v36, %v2815_v35 }
  0x5a   : > { %1155 = vmatpush.bf16.msra.mxu2 %v2960_v21  ;;  %v3000_v38 = vor.u32 %v3443_v32, %v2999_v31  ;;  %v3413_v39 = vld [vmem:[%s5233_s27 + $0xc4] sm:$0xf0]  ;;  %v2943_v40 = vld [vmem:[%s5233_s27 + $0x140] sm:$0xf]  ;;  %v2807_v47 = vld [vmem:[%s5233_s27 + $0x30] sm:$0xf] }
  0x5b   : > { %1170 = vmatpush.bf16.msra.mxu3 %v3008_v25  ;;  %v3429_v41 = vld [vmem:[%s5233_s27 + $0x144] sm:$0xf0]  ;;  %v2991_v42 = vld [vmem:[%s5233_s27 + $0x1a0] sm:$0xf]  ;;  %v2880_v45 = vor.u32 %v3413_v39, %v2879_v37  ;;  %v3395_v48 = vld [vmem:[%s5233_s27 + $0x34] sm:$0xf0] }
  0x5c   : > { %v3441_v43 = vld [vmem:[%s5233_s27 + $0x1a4] sm:$0xf0]  ;;  %1130 = vmatpush.bf16.msra.mxu0 %v2824_v29  ;;  %v2944_v46 = vor.u32 %v3429_v41, %v2943_v40  ;;  %v2871_v49 = vld [vmem:[%s5233_s27 + $0xb0] sm:$0xf]  ;;  %v3411_v51 = vld [vmem:[%s5233_s27 + $0xb4] sm:$0xf0]  ;;  %v2808_v56 = vor.u32 %v3395_v48, %v2807_v47 }
  0x5d   : > { %1143 = vmatpush.bf16.msra.mxu1 %v2888_v33  ;;  %v2992_v50 = vor.u32 %v3441_v43, %v2991_v42  ;;  %v2935_v52 = vld [vmem:[%s5233_s27 + $0x130] sm:$0xf]  ;;  %v3427_v53 = vld [vmem:[%s5233_s27 + $0x134] sm:$0xf0]  ;;  %v2872_v57 = vor.u32 %v3411_v51, %v2871_v49  ;;  %v2799_v59 = vld [vmem:[%s5233_s27 + $0x20] sm:$0xf] }
  0x5e   : > { %1156 = vmatpush.bf16.msra.mxu2 %v2952_v34  ;;  %v2983_v54 = vld [vmem:[%s5233_s27 + $0x190] sm:$0xf]  ;;  %v3439_v55 = vld [vmem:[%s5233_s27 + $0x194] sm:$0xf0]  ;;  %v2936_v58 = vor.u32 %v3427_v53, %v2935_v52  ;;  %v3393_v60 = vld [vmem:[%s5233_s27 + $0x24] sm:$0xf0] }
  0x5f   : > { %1171 = vmatpush.bf16.msra.mxu3 %v3000_v38  ;;  %v2863_v61 = vld [vmem:[%s5233_s27 + $0xa0] sm:$0xf]  ;;  %v2984_v62 = vor.u32 %v3439_v55, %v2983_v54  ;;  %v3409_v63 = vld [vmem:[%s5233_s27 + $0xa4] sm:$0xf0]  ;;  %v2800_v4 = vor.u32 %v3393_v60, %v2799_v59  ;;  %v3402_v5 = vld [vmem:[%s5233_s27 + $0x74] sm:$0xf] }
  0x60   : > { %1131 = vmatpush.bf16.msra.mxu0 %v2816_v44  ;;  %v2927_v0 = vld [vmem:[%s5233_s27 + $0x120] sm:$0xf]  ;;  %v3425_v1 = vld [vmem:[%s5233_s27 + $0x124] sm:$0xf0]  ;;  %v2841_v6 = vld [vmem:[%s5233_s27 + $0x78] sm:$0xf0]  ;;  %v2864_v8 = vor.u32 %v3409_v63, %v2863_v61 }
  0x61   : > { %1144 = vmatpush.bf16.msra.mxu1 %v2880_v45  ;;  %v2975_v2 = vld [vmem:[%s5233_s27 + $0x180] sm:$0xf]  ;;  %v3437_v3 = vld [vmem:[%s5233_s27 + $0x184] sm:$0xf0]  ;;  %v2791_v7 = vld [vmem:[%s5233_s27 + $0x10] sm:$0xf]  ;;  %v2928_v9 = vor.u32 %v3425_v1, %v2927_v0  ;;  %v2844_v17 = vor.u32 %v3402_v5, %v2841_v6 }
  0x62   : > { %1157 = vmatpush.bf16.msra.mxu2 %v2944_v46  ;;  %v3391_v10 = vld [vmem:[%s5233_s27 + $0x14] sm:$0xf0]  ;;  %v2855_v11 = vld [vmem:[%s5233_s27 + $0x90] sm:$0xf]  ;;  %v2976_v13 = vor.u32 %v3437_v3, %v2975_v2  ;;  %v744_v16 = vld [vmem:[%s4440_s30 + $0x8] sm:$0xff]  ;;  %s734_s29 = sand.u32 1, %s5235_s25  }
  0x63   : > { %1172 = vmatpush.bf16.msra.mxu3 %v2992_v50  ;;  %v3407_v12 = vld [vmem:[%s5233_s27 + $0x94] sm:$0xf0]  ;;  %v2919_v14 = vld [vmem:[%s5233_s27 + $0x110] sm:$0xf]  ;;  %v3400_v18 = vld [vmem:[%s5233_s27 + $0x64] sm:$0xf]  ;;  %v816_v21 = vunpack.c.h.b16 %v744_v16  ;;  %v2792_v22 = vor.u32 %v3391_v10, %v2791_v7  ;;  %v815_v42 = vunpack.c.l.b16 %v744_v16 }
  0x64   : > { %1132 = vmatpush.bf16.msra.mxu0 %v2808_v56  ;;  %v3423_v15 = vld [vmem:[%s5233_s27 + $0x114] sm:$0xf0]  ;;  %v2833_v19 = vld [vmem:[%s5233_s27 + $0x68] sm:$0xf0]  ;;  %v2783_v20 = vld [vmem:[%s5233_s27] sm:$0xf]  ;;  %v2856_v26 = vor.u32 %v3407_v12, %v2855_v11 }
  0x65   : > { %1145 = vmatpush.bf16.msra.mxu1 %v2872_v57  ;;  %v3389_v23 = vld [vmem:[%s5233_s27 + $0x4] sm:$0xf0]  ;;  %v2847_v24 = vld [vmem:[%s5233_s27 + $0x80] sm:$0xf]  ;;  %v2920_v27 = vor.u32 %v3423_v15, %v2919_v14  ;;  %v4492_v31 = vpack.c.b16 %v816_v21, %v816_v21  ;;  %v3398_v32 = vld [vmem:[%s5233_s27 + $0x54] sm:$0xf]  ;;  %v2836_v34 = vor.u32 %v3400_v18, %v2833_v19  ;;  %v4535_v56 = vpack.c.b16 %v815_v42, %v815_v42 }
  0x66   : > { %1158 = vmatpush.bf16.msra.mxu2 %v2936_v58  ;;  %v3405_v25 = vld [vmem:[%s5233_s27 + $0x84] sm:$0xf0]  ;;  %v2911_v28 = vld [vmem:[%s5233_s27 + $0x100] sm:$0xf]  ;;  %v3418_v33 = vld [vmem:[%s5233_s27 + $0xf4] sm:$0xf]  ;;  %v2784_v38 = vor.u32 %v3389_v23, %v2783_v20 }
  0x67   : > { %1173 = vmatpush.bf16.msra.mxu3 %v2984_v62  ;;  %v3421_v29 = vld [vmem:[%s5233_s27 + $0x104] sm:$0xf0]  ;;  %v743_v30 = vld [vmem:[%s4440_s30] sm:$0xff]  ;;  %v2905_v35 = vld [vmem:[%s5233_s27 + $0xf8] sm:$0xf0]  ;;  %v2848_v44 = vor.u32 %v3405_v25, %v2847_v24  ;;  %s2778_s14 = sshll.u32 %s734_s29, 2 }
  0x68   : > { %1133 = vmatpush.bf16.msra.mxu0 %v2800_v4  ;;  %v3434_v36 = vld [vmem:[%s5233_s27 + $0x174] sm:$0xf]  ;;  %v2969_v37 = vld [vmem:[%s5233_s27 + $0x178] sm:$0xf0]  ;;  %v813_v43 = vunpack.c.l.b16 %v743_v30  ;;  %v2912_v45 = vor.u32 %v3421_v29, %v2911_v28  ;;  %v814_v46 = vunpack.c.h.b16 %v743_v30  ;;  %v2908_v47 = vor.u32 %v3418_v33, %v2905_v35  ;;  %v3396_v49 = vld [vmem:[%s5233_s27 + $0x44] sm:$0xf] }
  0x69   : > { %1146 = vmatpush.bf16.msra.mxu1 %v2864_v8  ;;  %v2825_v39 = vld [vmem:[%s5233_s27 + $0x58] sm:$0xf0]  ;;  %v3446_v40 = vld [vmem:[%s5233_s27 + $0x1d4] sm:$0xf]  ;;  %v2972_v48 = vor.u32 %v3434_v36, %v2969_v37  ;;  %v3416_v50 = vld [vmem:[%s5233_s27 + $0xe4] sm:$0xf] }
  0x6a   : > { %1159 = vmatpush.bf16.msra.mxu2 %v2928_v9  ;;  %v3017_v41 = vld [vmem:[%s5233_s27 + $0x1d8] sm:$0xf0]  ;;  %v2828_v51 = vor.u32 %v3398_v32, %v2825_v39  ;;  %v2897_v53 = vld [vmem:[%s5233_s27 + $0xe8] sm:$0xf0]  ;;  %v3432_v54 = vld [vmem:[%s5233_s27 + $0x164] sm:$0xf]  ;;  %v4537_v57 = vpack.c.b16 %v813_v43, %v813_v43  ;;  %v4548_v61 = vpack.c.b16 %v814_v46, %v814_v46 }
  0x6b   : > { %1174 = vmatpush.bf16.msra.mxu3 %v2976_v13  ;;  %v3020_v52 = vor.u32 %v3446_v40, %v3017_v41  ;;  %v2961_v55 = vld [vmem:[%s5233_s27 + $0x168] sm:$0xf0]  ;;  %v3444_v59 = vld [vmem:[%s5233_s27 + $0x1c4] sm:$0xf]  ;;  %v2900_v62 = vor.u32 %v3416_v50, %v2897_v53  ;;  %v3394_v0 = vld [vmem:[%s5233_s27 + $0x34] sm:$0xf] }
  0x6c   : > { %1134 = vmatpush.bf16.msra.mxu0 %v2792_v22  ;;  %v2817_v58 = vld [vmem:[%s5233_s27 + $0x48] sm:$0xf0]  ;;  %v2964_v63 = vor.u32 %v3432_v54, %v2961_v55  ;;  %v3414_v1 = vld [vmem:[%s5233_s27 + $0xd4] sm:$0xf]  ;;  %v2889_v4 = vld [vmem:[%s5233_s27 + $0xd8] sm:$0xf0]  ;;  %1455 = vrot.lane.b32.xlu0 %v4537_v57, %s4042_s23 }
  0x6d   : > { %1147 = vmatpush.bf16.msra.mxu1 %v2856_v26  ;;  %v3009_v60 = vld [vmem:[%s5233_s27 + $0x1c8] sm:$0xf0]  ;;  %v2820_v2 = vor.u32 %v3396_v49, %v2817_v58  ;;  %v3430_v5 = vld [vmem:[%s5233_s27 + $0x154] sm:$0xf]  ;;  %v2953_v6 = vld [vmem:[%s5233_s27 + $0x158] sm:$0xf0]  ;;  %v2892_v10 = vor.u32 %v3414_v1, %v2889_v4 }
  0x6e   : > { %1160 = vmatpush.bf16.msra.mxu2 %v2920_v27  ;;  %3021 = vmatmul.msk.bf16.vlgmr.msra.gmra.mxu3 %vm1124_vm0, %v4492_v31  ;;  %v3012_v3 = vor.u32 %v3444_v59, %v3009_v60  ;;  %v2809_v7 = vld [vmem:[%s5233_s27 + $0x38] sm:$0xf0]  ;;  %v3442_v8 = vld [vmem:[%s5233_s27 + $0x1b4] sm:$0xf]  ;;  %v2956_v11 = vor.u32 %v3430_v5, %v2953_v6  ;;  %v3392_v12 = vld [vmem:[%s5233_s27 + $0x24] sm:$0xf] }
  0x6f   : > { %1180 = vmatpush.bf16.msrb.mxu3 %v2844_v17  ;;  %v3001_v9 = vld [vmem:[%s5233_s27 + $0x1b8] sm:$0xf0]  ;;  %v3412_v13 = vld [vmem:[%s5233_s27 + $0xc4] sm:$0xf]  ;;  %v2812_v14 = vor.u32 %v3394_v0, %v2809_v7  ;;  %v2881_v16 = vld [vmem:[%s5233_s27 + $0xc8] sm:$0xf0] }
  0x70   : > { %1135 = vmatpush.bf16.msra.mxu0 %v2784_v38  ;;  %v3004_v15 = vor.u32 %v3442_v8, %v3001_v9  ;;  %v3428_v17 = vld [vmem:[%s5233_s27 + $0x144] sm:$0xf]  ;;  %v2945_v18 = vld [vmem:[%s5233_s27 + $0x148] sm:$0xf0]  ;;  %v2884_v22 = vor.u32 %v3412_v13, %v2881_v16  ;;  %v3390_v24 = vld [vmem:[%s5233_s27 + $0x14] sm:$0xf] }
  0x71   : > { %1148 = vmatpush.bf16.msra.mxu1 %v2848_v44  ;;  %v2801_v19 = vld [vmem:[%s5233_s27 + $0x28] sm:$0xf0]  ;;  %v3440_v20 = vld [vmem:[%s5233_s27 + $0x1a4] sm:$0xf]  ;;  %v2948_v23 = vor.u32 %v3428_v17, %v2945_v18  ;;  %v3410_v25 = vld [vmem:[%s5233_s27 + $0xb4] sm:$0xf] }
  0x72   : > { %1161 = vmatpush.bf16.msra.mxu2 %v2912_v45  ;;  %v2993_v21 = vld [vmem:[%s5233_s27 + $0x1a8] sm:$0xf0]  ;;  %v2804_v26 = vor.u32 %v3392_v12, %v2801_v19  ;;  %v2873_v28 = vld [vmem:[%s5233_s27 + $0xb8] sm:$0xf0]  ;;  %v3426_v29 = vld [vmem:[%s5233_s27 + $0x134] sm:$0xf] }
  0x73   : > { %1181 = vmatpush.bf16.msrb.mxu3 %v2836_v34  ;;  %1136 = vmatmul.bf16.vlgmr.msra.gmra.mxu0 %v4537_v57  ;;  %v2996_v27 = vor.u32 %v3440_v20, %v2993_v21  ;;  %v2937_v30 = vld [vmem:[%s5233_s27 + $0x138] sm:$0xf0]  ;;  %v3438_v33 = vld [vmem:[%s5233_s27 + $0x194] sm:$0xf]  ;;  %v2876_v35 = vor.u32 %v3410_v25, %v2873_v28  ;;  %v3388_v37 = vld [vmem:[%s5233_s27 + $0x4] sm:$0xf] }
  0x74   : > { %1193 = vmatpush.bf16.msrb.mxu0 %v2908_v47  ;;  %1149 = vmatmul.bf16.vlgmr.msra.gmra.mxu1 %v4548_v61  ;;  %v2793_v32 = vld [vmem:[%s5233_s27 + $0x18] sm:$0xf0]  ;;  %v2940_v36 = vor.u32 %v3426_v29, %v2937_v30  ;;  %v3408_v38 = vld [vmem:[%s5233_s27 + $0xa4] sm:$0xf]  ;;  %v2865_v41 = vld [vmem:[%s5233_s27 + $0xa8] sm:$0xf0] }
  0x75   : > { %1206 = vmatpush.bf16.msrb.mxu1 %v2972_v48  ;;  %1162 = vmatmul.bf16.vlgmr.msra.gmra.mxu2 %v4535_v56  ;;  %v2985_v34 = vld [vmem:[%s5233_s27 + $0x198] sm:$0xf0]  ;;  %v2796_v39 = vor.u32 %v3390_v24, %v2793_v32  ;;  %v3424_v42 = vld [vmem:[%s5233_s27 + $0x124] sm:$0xf]  ;;  %v2929_v43 = vld [vmem:[%s5233_s27 + $0x128] sm:$0xf0]  ;;  %v2868_v47 = vor.u32 %v3408_v38, %v2865_v41 }
  0x76   : > { %1221 = vmatpush.bf16.msrb.mxu2 %v3020_v52  ;;  %v2988_v40 = vor.u32 %v3438_v33, %v2985_v34  ;;  %v2785_v44 = vld [vmem:[%s5233_s27 + $0x8] sm:$0xf0]  ;;  %v3436_v45 = vld [vmem:[%s5233_s27 + $0x184] sm:$0xf]  ;;  %v2932_v48 = vor.u32 %v3424_v42, %v2929_v43  ;;  %v2857_v52 = vld [vmem:[%s5233_s27 + $0x98] sm:$0xf0]  ;;  %1457 = vrot.lane.b32.xlu0 %v4548_v61, %s4042_s23 }
  0x77   : > { %1182 = vmatpush.bf16.msrb.mxu3 %v2828_v51  ;;  %v2977_v46 = vld [vmem:[%s5233_s27 + $0x188] sm:$0xf0]  ;;  %v2788_v49 = vor.u32 %v3388_v37, %v2785_v44  ;;  %v3406_v51 = vld [vmem:[%s5233_s27 + $0x94] sm:$0xf]  ;;  %v2921_v54 = vld [vmem:[%s5233_s27 + $0x118] sm:$0xf0] }
  0x78   : > { %1194 = vmatpush.bf16.msrb.mxu0 %v2900_v62  ;;  %v2980_v50 = vor.u32 %v3436_v45, %v2977_v46  ;;  %v3422_v53 = vld [vmem:[%s5233_s27 + $0x114] sm:$0xf]  ;;  %v1279_v55 = vld [vmem:[%s5179_s7 + $0x78] sm:$0xff]  ;;  %v2860_v58 = vor.u32 %v3406_v51, %v2857_v52  ;;  %v3404_v60 = vld [vmem:[%s5233_s27 + $0x84] sm:$0xf]  ;;  %s3384_s30 = sshll.u32 %s4164_s1, 2 }
  0x79   : > { %1207 = vmatpush.bf16.msrb.mxu1 %v2964_v63  ;;  %v2924_v59 = vor.u32 %v3422_v53, %v2921_v54  ;;  %v2849_v62 = vld [vmem:[%s5233_s27 + $0x88] sm:$0xf0]  ;;  %v3420_v63 = vld [vmem:[%s5233_s27 + $0x104] sm:$0xf]  ;;  %v1278_v1 = vld [vmem:[%s5179_s7 + $0x70] sm:$0xff]  ;;  %s2604_s20 = scalar_lea.hbm %s5236_s21, %s3384_s30  ;;  %s736_s22 = scalar_lea.vmem [#allocation17], %s2778_s14 }
  0x7a   : > { %1222 = vmatpush.bf16.msrb.mxu2 %v3012_v3  ;;  %v2913_v0 = vld [vmem:[%s5233_s27 + $0x108] sm:$0xf0]  ;;  %v1276_v5 = vld [vmem:[%s5179_s7 + $0x60] sm:$0xff]  ;;  %v1274_v6 = vld [vmem:[%s5179_s7 + $0x50] sm:$0xff]  ;;  %s2606_s8 = sshll.u32 %s736_s22, 4  ;;  %s2608_s0 = sshll.u32 %s2604_s20, 4  ;;  %s2607_s8 = int_to_ptr.vmem [resolvable:$true] %s2606_s8  ;;  %s2609_s0 = int_to_ptr.hbm [resolvable:$true] %s2608_s0 }
  0x7b   : > { %1183 = vmatpush.bf16.msrb.mxu3 %v2820_v2  ;;  %v2852_v2 = vor.u32 %v3404_v60, %v2849_v62  ;;  %v2916_v3 = vor.u32 %v3420_v63, %v2913_v0  ;;  %v1277_v4 = vld [vmem:[%s5179_s7 + $0x68] sm:$0xff]  ;;  %v1268_v9 = vld [vmem:[%s5179_s7 + $0x20] sm:$0xff]  ;;  %v1266_v12 = vld [vmem:[%s5179_s7 + $0x10] sm:$0xff]  ;;  %s2594_s24 = scalar_lea.sflag [#allocation4], %s734_s29  ;;  %s3959_s23 = sshra.s32 %s2609_s0, 4  ;;  %s3960_s23 = int_to_ptr.hbm [resolvable:$true] %s3959_s23 }
  0x7c   : > { %1195 = vmatpush.bf16.msrb.mxu0 %v2892_v10  ;;  %v1273_v7 = vld [vmem:[%s5179_s7 + $0x48] sm:$0xff]  ;;  %v1292_v16 = vld [vmem:[%s5179_s7 + $0xe0] sm:$0xff]  ;;  %v1291_v18 = vld [vmem:[%s5179_s7 + $0xd8] sm:$0xff]  ;;  %s3961_s1 = scalar_lea.hbm %s3960_s23, 4  ;;  %s3965_s25 = scalar_lea.hbm %s5237_s3, 8 }
  0x7d   : > { %1208 = vmatpush.bf16.msrb.mxu1 %v2956_v11  ;;  %v1269_v8 = vld [vmem:[%s5179_s7 + $0x28] sm:$0xff]  ;;  %v1267_v11 = vld [vmem:[%s5179_s7 + $0x18] sm:$0xff]  ;;  %v1290_v19 = vld [vmem:[%s5179_s7 + $0xd0] sm:$0xff]  ;;  %p3962_p0 = scmp.ne.s32.totalorder %s3960_s23, %s3961_s1  ;;  %p3966_p3 = scmp.lt.s32.totalorder %s3960_s23, %s5237_s3 }
  0x7e   : > { %1223 = vmatpush.bf16.msrb.mxu2 %v3004_v15  ;;  %v1293_v10 = vld [vmem:[%s5179_s7 + $0xe8] sm:$0xff]  ;;  %v805_v15 = vld [vmem:[#allocation2] sm:$0x3]  ;;  %v1286_v30 = vld [vmem:[%s5179_s7 + $0xb0] sm:$0xff]  ;;  %p3967_p4 = scmp.lt.s32.totalorder %s3965_s25, %s3961_s1 }
  0x7f   : > { %1184 = vmatpush.bf16.msrb.mxu3 %v2812_v14  ;;  %v1265_v13 = vld [vmem:[%s5179_s7 + $0x8] sm:$0xff]  ;;  %v1264_v14 = vld [vmem:[%s5179_s7] sm:$0xff]  ;;  %v807_v17 = vperm.slane %v805_v15, 0  ;;  %v1283_v42 = vld [vmem:[%s5179_s7 + $0x98] sm:$0xff]  ;;  %p3963_p1 = pnand %p3962_p0, %p4181_p5 }
  0x80   : > { %1196 = vmatpush.bf16.msrb.mxu0 %v2884_v22  ;;  %v1289_v24 = vld [vmem:[%s5179_s7 + $0xc8] sm:$0xff]  ;;  %v1282_v44 = vld [vmem:[%s5179_s7 + $0x90] sm:$0xff]  ;;  %p3968_p7 = por %p3967_p4, %p3966_p3 }
  0x81   : > { %1209 = vmatpush.bf16.msrb.mxu1 %v2948_v23  ;;  %p3964_p2 = pneg %p3963_p1 }
  0x82   : > { %1224 = vmatpush.bf16.msrb.mxu2 %v2996_v27  ;;  %v1287_v27 = vld [vmem:[%s5179_s7 + $0xb8] sm:$0xff] }
  0x83   : > { %1185 = vmatpush.bf16.msrb.mxu3 %v2804_v26  ;;  %v1288_v26 = vld [vmem:[%s5179_s7 + $0xc0] sm:$0xff]  ;;  %p3969_p8 = pnand %p3968_p7, %p3964_p2 }
  0x84   : > { %1197 = vmatpush.bf16.msrb.mxu0 %v2876_v35 }
  0x85   : > { %1210 = vmatpush.bf16.msrb.mxu1 %v2940_v36  ;;  %v1285_v36 = vld [vmem:[%s5179_s7 + $0xa8] sm:$0xff] }
  0x86   : > { %1225 = vmatpush.bf16.msrb.mxu2 %v2988_v40 }
  0x87   : > { %1186 = vmatpush.bf16.msrb.mxu3 %v2796_v39  ;;  %v1284_v39 = vld [vmem:[%s5179_s7 + $0xa0] sm:$0xff] }
  0x88   : > { %1198 = vmatpush.bf16.msrb.mxu0 %v2868_v47  ;;  %v1281_v47 = vld [vmem:[%s5179_s7 + $0x88] sm:$0xff] }
  0x89   : > { %1211 = vmatpush.bf16.msrb.mxu1 %v2932_v48 }
  0x8a   : > { %1226 = vmatpush.bf16.msrb.mxu2 %v2980_v50  ;;  %v1280_v50 = vld [vmem:[%s5179_s7 + $0x80] sm:$0xff] }
  0x8b   : > { %1187 = vmatpush.bf16.msrb.mxu3 %v2788_v49 }
  0x8c   : > { %1199 = vmatpush.bf16.msrb.mxu0 %v2860_v58 }
  0x8d   : > { %3022 = vmatmul.msk.bf16.vlgmr.msrb.gmra.mxu2 %vm1124_vm0, %v4492_v31  ;;  %1212 = vmatpush.bf16.msrb.mxu1 %v2924_v59  ;;  %v1275_v31 = vld [vmem:[%s5179_s7 + $0x58] sm:$0xff]  ;;  %v808_v59 = vperm.slane %v805_v15, 1 }
  0x8e   : > { %1297 = vmatpush.msra.mxu2 %v1279_v55  ;;  %1188 = vmatmul.bf16.vlgmr.msrb.gmra.mxu3 %v4537_v57  ;;  %v1271_v57 = vld [vmem:[%s5179_s7 + $0x38] sm:$0xff] }
  0x8f   : > { %1319 = vmatpush.msra.mxu3 %v1293_v10 }
  0x90   : > { %1298 = vmatpush.msra.mxu2 %v1278_v1  ;;  %1200 = vmatpush.bf16.msrb.mxu0 %v2852_v2 }
  0x91   : > { %1213 = vmatpush.bf16.msrb.mxu1 %v2916_v3  ;;  %1320 = vmatpush.msra.mxu3 %v1292_v16 }
  0x92   : > { %1299 = vmatpush.msra.mxu2 %v1277_v4 }
  0x93   : > { %1201 = vmatmul.bf16.vlgmr.msrb.gmra.mxu0 %v4548_v61  ;;  %v1270_v61 = vld [vmem:[%s5179_s7 + $0x30] sm:$0xff]  ;;  %1321 = vmatpush.msra.mxu3 %v1291_v18 }
  0x94   : > { %1300 = vmatpush.msra.mxu2 %v1276_v5  ;;  %1214 = vmatmul.bf16.vlgmr.msrb.gmra.mxu1 %v4535_v56  ;;  %v1272_v56 = vld [vmem:[%s5179_s7 + $0x40] sm:$0xff] }
  0x95   : > { %1322 = vmatpush.msra.mxu3 %v1290_v19 }
  0x96   : > { %1301 = vmatpush.msra.mxu2 %v1275_v31 }
  0x97   : > { %1323 = vmatpush.msra.mxu3 %v1289_v24  ;;  %v1357_v24 = vld [vmem:[#allocation11 + $0x10] sm:$0x3] }
  0x98   : > { %1302 = vmatpush.msra.mxu2 %v1274_v6  ;;  %3024 = vmatpush.msk.msra.mxu0 %vm1363_vm3, %v1357_v24 }
  0x99   : > { %1324 = vmatpush.msra.mxu3 %v1288_v26 }
  0x9a   : > { %1303 = vmatpush.msra.mxu2 %v1273_v7 }
  0x9b   : > { %1325 = vmatpush.msra.mxu3 %v1287_v27 }
  0x9c   : > { %1304 = vmatpush.msra.mxu2 %v1272_v56 }
  0x9d   : > { %1326 = vmatpush.msra.mxu3 %v1286_v30 }
  0x9e   : > { %1305 = vmatpush.msra.mxu2 %v1271_v57 }
  0x9f   : > { %1327 = vmatpush.msra.mxu3 %v1285_v36  ;;  %v3460_v36 = vld [vmem:[#allocation8 + $0x64] sm:$0xf] }
  0xa0   : > { %1306 = vmatpush.msra.mxu2 %v1270_v61 }
  0xa1   : > { %1328 = vmatpush.msra.mxu3 %v1284_v39 }
  0xa2   : > { %1307 = vmatpush.msra.mxu2 %v1269_v8 }
  0xa3   : > { %1329 = vmatpush.msra.mxu3 %v1283_v42  ;;  %v3458_v42 = vld [vmem:[#allocation8 + $0x54] sm:$0xf] }
  0xa4   : > { %1308 = vmatpush.msra.mxu2 %v1268_v9 }
  0xa5   : > { %1330 = vmatpush.msra.mxu3 %v1282_v44  ;;  %v3072_v44 = vld [vmem:[#allocation8 + $0x58] sm:$0xf0] }
  0xa6   : > { %1309 = vmatpush.msra.mxu2 %v1267_v11 }
  0xa7   : > { %1331 = vmatpush.msra.mxu3 %v1281_v47  ;;  %v3457_v47 = vld [vmem:[#allocation8 + $0x44] sm:$0xf0] }
  0xa8   : > { %1310 = vmatpush.msra.mxu2 %v1266_v12 }
  0xa9   : > { %1332 = vmatpush.msra.mxu3 %v1280_v50  ;;  %v3064_v50 = vld [vmem:[#allocation8 + $0x48] sm:$0xf0] }
  0xaa   : > { %1311 = vmatpush.msra.mxu2 %v1265_v13 }
  0xac   : > { %1312 = vmatpush.msra.mxu2 %v1264_v14 }
  0xf0   : > { %v1137_v20 = vpop.f32.mrf.mxu0 }
  0xf1   : > { %v1176_v21 = vpop.f32.mrf.mxu3  ;;  %v1138_v22 = vadd.f32 %v1137_v20, %v807_v17  ;;  %v1150_v23 = vpop.f32.mrf.mxu1 }
  0xf3   : > { %v1151_v25 = vadd.f32 %v1150_v23, %v1138_v22 }
  0xf8   : > { %v1163_v28 = vpop.f32.mrf.mxu2  ;;  %v1139_v33 = vpop.f32.mrf.mxu0 }
  0xf9   : > { %v1164_v29 = vadd.f32 %v1163_v28, %v1151_v25  ;;  %v1178_v32 = vpop.f32.mrf.mxu3  ;;  %v1152_v35 = vpop.f32.mrf.mxu1  ;;  %v1358_v25 = vld [vmem:[#allocation11 + $0x18] sm:$0x3]  ;;  %v1355_v28 = vld [vmem:[#allocation11] sm:$0xff] }
  0xfa   : > { %3026 = vmatpush.msk.msra.mxu1 %vm1363_vm3, %v1358_v25  ;;  %1385 = vmatpush.msra.mxu0 %v1355_v28  ;;  %v3078_v33 = vld [vmem:[#allocation8 + $0x60] sm:$0xf]  ;;  %v3461_v35 = vld [vmem:[#allocation8 + $0x64] sm:$0xf0]  ;;  %v1602_v25 = vld [vmem:[%s5181_s9 + $0xd8] sm:$0xff] }
  0xfb   : > { %v4752_v34 = vadd.f32 %v1176_v21, %v1164_v29  ;;  %v1448_v21 = vld [vmem:[#allocation8 + $0x70] sm:$0xff]  ;;  %v1356_v29 = vld [vmem:[#allocation11 + $0x8] sm:$0xff] }
  0xfc   : > { %v1504_v22 = vunpack.c.l.b16 %v1448_v21  ;;  %v1505_v23 = vunpack.c.h.b16 %v1448_v21  ;;  %1405 = vmatpush.msra.mxu1 %v1356_v29  ;;  %v1604_v21 = vld [vmem:[%s5181_s9 + $0xe8] sm:$0xff]  ;;  %v1586_v28 = vld [vmem:[%s5181_s9 + $0x58] sm:$0xff] }
  0xfd   : > { %v1232_v37 = vrot.slane %v4752_v34, 4  ;;  %v1246_v38 = vmul.f32 %v4752_v34, %v4752_v34  ;;  %1630 = vmatpush.msrb.mxu2 %v1604_v21  ;;  %v1600_v29 = vld [vmem:[%s5181_s9 + $0xc8] sm:$0xff] }
  0xfe   : > { %v1520_v26 = vpack.c.b16 %v1504_v22, %v1504_v22  ;;  %v1521_v27 = vpack.c.b16 %v1505_v23, %v1505_v23  ;;  %v1603_v22 = vld [vmem:[%s5181_s9 + $0xe0] sm:$0xff]  ;;  %v1588_v23 = vld [vmem:[%s5181_s9 + $0x68] sm:$0xff] }
  0xff   : > { %v1233_v40 = vadd.f32 %v1232_v37, %v4752_v34  ;;  %v1248_v41 = vrot.slane %v1246_v38, 4  ;;  %v3079_v37 = vor.u32 %v3461_v35, %v3078_v33  ;;  %1631 = vmatpush.msrb.mxu2 %v1603_v22  ;;  %v1584_v33 = vld [vmem:[%s5181_s9 + $0x48] sm:$0xff]  ;;  %v3487_v22 = vld [vmem:[#allocation13 + $0xcc] sm:$0xf0] }
 0x100   : > { %v1165_v43 = vpop.f32.mrf.mxu2  ;;  %v1542_v30 = vsel %vm1540_vm4, %v1520_v26, 0  ;;  %v1545_v32 = vsel %vm1540_vm4, %v1521_v27, 0  ;;  %v1587_v26 = vld [vmem:[%s5181_s9 + $0x60] sm:$0xff]  ;;  %v1601_v27 = vld [vmem:[%s5181_s9 + $0xd0] sm:$0xff]  ;;  %v3197_v21 = vld [vmem:[#allocation13 + $0x68] sm:$0xf0] }
 0x101   : > { %v1234_v45 = vrot.slane %v1233_v40, 2  ;;  %v1249_v46 = vadd.f32 %v1248_v41, %v1246_v38  ;;  %1547 = vmatpush.bf16.msrb.mxu0 %v1542_v30  ;;  %1560 = vmatpush.bf16.msrb.mxu1 %v1545_v32  ;;  %v3080_v38 = vld [vmem:[#allocation8 + $0x68] sm:$0xf0]  ;;  %v3459_v41 = vld [vmem:[#allocation8 + $0x54] sm:$0xf0] }
 0x102   : > { %v3083_v39 = vor.u32 %v3460_v36, %v3080_v38  ;;  %1632 = vmatpush.msrb.mxu2 %v1602_v25  ;;  %v1585_v30 = vld [vmem:[%s5181_s9 + $0x50] sm:$0xff]  ;;  %v1599_v32 = vld [vmem:[%s5181_s9 + $0xc0] sm:$0xff]  ;;  %v1598_v36 = vld [vmem:[%s5181_s9 + $0xb8] sm:$0xff] }
 0x103   : > { %v1235_v48 = vadd.f32 %v1234_v45, %v1233_v40  ;;  %v1250_v49 = vrot.slane %v1249_v46, 2  ;;  %v3070_v40 = vld [vmem:[#allocation8 + $0x50] sm:$0xf]  ;;  %v3075_v45 = vor.u32 %v3458_v42, %v3072_v44  ;;  %v1583_v38 = vld [vmem:[%s5181_s9 + $0x40] sm:$0xff] }
 0x104   : > { %v3071_v43 = vor.u32 %v3459_v41, %v3070_v40  ;;  %1633 = vmatpush.msrb.mxu2 %v1601_v27  ;;  %v1582_v40 = vld [vmem:[%s5181_s9 + $0x38] sm:$0xff] }
 0x105   : > { %v1236_v51 = vrot.slane %v1235_v48, 1  ;;  %v1251_v52 = vadd.f32 %v1250_v49, %v1249_v46  ;;  %1548 = vmatpush.bf16.msrb.mxu0 %v3079_v37  ;;  %1561 = vmatpush.bf16.msrb.mxu1 %v3083_v39  ;;  %v3062_v46 = vld [vmem:[#allocation8 + $0x40] sm:$0xf]  ;;  %v3121_v27 = vld [vmem:[#allocation13 + $0xb8] sm:$0xf] }
 0x106   : > { %v3063_v49 = vor.u32 %v3457_v47, %v3062_v46  ;;  %1634 = vmatpush.msrb.mxu2 %v1600_v29 }
 0x107   : > { %v1252_v53 = vrot.slane %v1251_v52, 1  ;;  %v1237_v54 = vadd.f32 %v1236_v51, %v1235_v48  ;;  %v3456_v48 = vld [vmem:[#allocation8 + $0x44] sm:$0xf] }
 0x108   : > { %v3067_v51 = vor.u32 %v3456_v48, %v3064_v50  ;;  %1635 = vmatpush.msrb.mxu2 %v1599_v32  ;;  %v1597_v50 = vld [vmem:[%s5181_s9 + $0xb0] sm:$0xff] }
 0x109   : > { %v1253_v55 = vadd.f32 %v1252_v53, %v1251_v52  ;;  %1549 = vmatpush.bf16.msrb.mxu0 %v3071_v43  ;;  %1562 = vmatpush.bf16.msrb.mxu1 %v3075_v45  ;;  %v3054_v52 = vld [vmem:[#allocation8 + $0x30] sm:$0xf]  ;;  %v3455_v53 = vld [vmem:[#allocation8 + $0x34] sm:$0xf0]  ;;  %v1456_v43 = vpop.permute.xlu0 %1455 }
 0x10a   : > { %1636 = vmatpush.msrb.mxu2 %v1598_v36  ;;  %v3472_v36 = vld [vmem:[#allocation13 + $0x54] sm:$0xf] }
 0x10b   : > { %v1262_v58 = vsel %vm1261_vm1, %v1237_v54, %v1253_v55  ;;  %v3454_v54 = vld [vmem:[#allocation8 + $0x34] sm:$0xf]  ;;  %v3055_v55 = vor.u32 %v3455_v53, %v3054_v52  ;;  %v1596_v52 = vld [vmem:[%s5181_s9 + $0xa8] sm:$0xff]  ;;  %v1579_v53 = vld [vmem:[%s5181_s9 + $0x20] sm:$0xff] }
 0x10c   : > { %1313 = vmatmul.f32.vlgmr.msra.gmra.mxu2 %v1262_v58  ;;  %v3056_v58 = vld [vmem:[#allocation8 + $0x38] sm:$0xf0] }
 0x10d   : > { %1550 = vmatpush.bf16.msrb.mxu0 %v3063_v49  ;;  %1563 = vmatpush.bf16.msrb.mxu1 %v3067_v51  ;;  %v1581_v49 = vld [vmem:[%s5181_s9 + $0x30] sm:$0xff]  ;;  %v1580_v51 = vld [vmem:[%s5181_s9 + $0x28] sm:$0xff] }
 0x10e   : > { %1637 = vmatpush.msrb.mxu2 %v1597_v50  ;;  %v3470_v50 = vld [vmem:[#allocation13 + $0x44] sm:$0xf] }
 0x110   : > { %v1228_v62 = vpop.f32.mrf.mxu2  ;;  %v1202_v0 = vpop.f32.mrf.mxu0  ;;  %1638 = vmatpush.msrb.mxu2 %v1596_v52  ;;  %v3483_v52 = vld [vmem:[#allocation13 + $0xac] sm:$0xf0] }
 0x111   : > { %v1189_v60 = vpop.f32.mrf.mxu3  ;;  %v1215_v1 = vpop.f32.mrf.mxu1  ;;  %1551 = vmatpush.bf16.msrb.mxu0 %v3055_v55  ;;  %v1578_v55 = vld [vmem:[%s5181_s9 + $0x18] sm:$0xff] }
 0x112   : > { %v1190_v63 = vadd.f32 %v1189_v60, %v808_v59  ;;  %v3059_v59 = vor.u32 %v3454_v54, %v3056_v58  ;;  %v3046_v60 = vld [vmem:[#allocation8 + $0x20] sm:$0xf]  ;;  %v1458_v47 = vpop.permute.xlu0 %1457  ;;  %v1594_v58 = vld [vmem:[%s5181_s9 + $0x98] sm:$0xff] }
 0x113   : > { %v1460_v48 = vsel %vm1459_vm9, %v1456_v43, %v1458_v47  ;;  %v1595_v54 = vld [vmem:[%s5181_s9 + $0xa0] sm:$0xff]  ;;  %v3113_v43 = vld [vmem:[#allocation13 + $0xa8] sm:$0xf] }
 0x114   : > { %v1203_v2 = vadd.f32 %v1202_v0, %v1190_v63  ;;  %1564 = vmatpush.bf16.msrb.mxu1 %v3059_v59  ;;  %v3452_v63 = vld [vmem:[#allocation8 + $0x24] sm:$0xf]  ;;  %1639 = vmatpush.msrb.mxu2 %v1595_v54  ;;  %v1577_v59 = vld [vmem:[%s5181_s9 + $0x10] sm:$0xff] }
 0x115   : > { %v3115_v54 = vld [vmem:[#allocation13 + $0xb0] sm:$0xf0] }
 0x116   : > { %v1216_v3 = vadd.f32 %v1215_v1, %v1203_v2  ;;  %v3048_v1 = vld [vmem:[#allocation8 + $0x28] sm:$0xf0]  ;;  %1640 = vmatpush.msrb.mxu2 %v1594_v58 }
 0x117   : > { %v3051_v2 = vor.u32 %v3452_v63, %v3048_v1  ;;  %v1592_v63 = vld [vmem:[%s5181_s9 + $0x88] sm:$0xff]  ;;  %v1591_v1 = vld [vmem:[%s5181_s9 + $0x80] sm:$0xff] }
 0x118   : > { %v4777_v4 = vadd.f32 %v1228_v62, %v1216_v3  ;;  %v1230_v31 = vpop.f32.mrf.mxu2  ;;  %v1204_v57 = vpop.f32.mrf.mxu0  ;;  %v3453_v62 = vld [vmem:[#allocation8 + $0x24] sm:$0xf0]  ;;  %v3038_v3 = vld [vmem:[#allocation8 + $0x10] sm:$0xf] }
 0x119   : > { %v1191_v5 = vpop.f32.mrf.mxu3  ;;  %v1217_v61 = vpop.f32.mrf.mxu1  ;;  %v3047_v0 = vor.u32 %v3453_v62, %v3046_v60  ;;  %1565 = vmatpush.bf16.msrb.mxu1 %v3051_v2  ;;  %v1593_v60 = vld [vmem:[%s5181_s9 + $0x90] sm:$0xff]  ;;  %v1576_v62 = vld [vmem:[%s5181_s9 + $0x8] sm:$0xff] }
 0x11a   : > { %v1239_v6 = vsel %vm1238_vm2, %v4777_v4, 0.0  ;;  %v1247_v7 = vmul.f32 %v4777_v4, %v4777_v4  ;;  %v3451_v5 = vld [vmem:[#allocation8 + $0x14] sm:$0xf0]  ;;  %1641 = vmatpush.msrb.mxu2 %v1593_v60  ;;  %v1702_v2 = vld [vmem:[#allocation13 + $0xe8] sm:$0xff] }
 0x11b   : > { %v1240_v56 = vrot.slane %v1239_v6, 4  ;;  %1552 = vmatpush.bf16.msrb.mxu0 %v3047_v0  ;;  %v3039_v31 = vor.u32 %v3451_v5, %v3038_v3  ;;  %v1575_v0 = vld [vmem:[%s5181_s9] sm:$0xff]  ;;  %v1776_v3 = vunpack.c.l.b16 %v1702_v2  ;;  %v1777_v5 = vunpack.c.h.b16 %v1702_v2  ;;  %v3105_v2 = vld [vmem:[#allocation13 + $0x98] sm:$0xf] }
 0x11c   : > { %v1254_v8 = vsel %vm1238_vm2, %v1247_v7, 0.0  ;;  %v3040_v7 = vld [vmem:[#allocation8 + $0x18] sm:$0xf0]  ;;  %1642 = vmatpush.msrb.mxu2 %v1592_v63 }
 0x11d   : > { %v1241_v9 = vadd.f32 %v1240_v56, %v1239_v6  ;;  %v1255_v10 = vrot.slane %v1254_v8, 4  ;;  %v3450_v6 = vld [vmem:[#allocation8 + $0x14] sm:$0xf] }
 0x11e   : > { %v3043_v61 = vor.u32 %v3450_v6, %v3040_v7  ;;  %1643 = vmatpush.msrb.mxu2 %v1591_v1  ;;  %v3489_v6 = vld [vmem:[#allocation13 + $0xdc] sm:$0xf0]  ;;  %v1792_v7 = vpack.c.b16 %v1776_v3, %v1776_v3  ;;  %v1449_v1 = vld [vmem:[#allocation10] sm:$0x3] }
 0x11f   : > { %v1242_v11 = vrot.slane %v1241_v9, 2  ;;  %v1256_v12 = vadd.f32 %v1255_v10, %v1254_v8  ;;  %v3030_v8 = vld [vmem:[#allocation8] sm:$0xf]  ;;  %v3448_v10 = vld [vmem:[#allocation8 + $0x4] sm:$0xf]  ;;  %1553 = vmatpush.bf16.msrb.mxu0 %v3039_v31 }
 0x120   : > { %1566 = vmatpush.bf16.msrb.mxu1 %v3043_v61  ;;  %v3137_v31 = vld [vmem:[#allocation13 + $0xd8] sm:$0xf]  ;;  %v3139_v61 = vld [vmem:[#allocation13 + $0xe0] sm:$0xf0] }
 0x121   : > { %v1243_v13 = vadd.f32 %v1242_v11, %v1241_v9  ;;  %v1257_v14 = vrot.slane %v1256_v12, 2  ;;  %v3449_v9 = vld [vmem:[#allocation8 + $0x4] sm:$0xf0] }
 0x123   : > { %v1244_v15 = vrot.slane %v1243_v13, 1  ;;  %v1258_v16 = vadd.f32 %v1257_v14, %v1256_v12  ;;  %v3031_v12 = vor.u32 %v3449_v9, %v3030_v8  ;;  %v1687_v8 = vld [vmem:[#allocation13 + $0x70] sm:$0xff] }
 0x124   : > { %v1886_v9 = vunpack.c.l.b16 %v1687_v8 }
 0x125   : > { %v1259_v17 = vrot.slane %v1258_v16, 1  ;;  %v1245_v18 = vadd.f32 %v1244_v15, %v1243_v13  ;;  %v3032_v13 = vld [vmem:[#allocation8 + $0x8] sm:$0xf0]  ;;  %1554 = vmatpush.bf16.msrb.mxu0 %v3031_v12 }
 0x126   : > { %v3035_v14 = vor.u32 %v3448_v10, %v3032_v13  ;;  %v1887_v10 = vunpack.c.h.b16 %v1687_v8  ;;  %v3138_v13 = vor.u32 %v3489_v6, %v3137_v31  ;;  %v3114_v31 = vor.u32 %v3483_v52, %v3113_v43 }
 0x127   : > { %v1260_v19 = vadd.f32 %v1259_v17, %v1258_v16 }
 0x128   : > { %1567 = vmatpush.bf16.msrb.mxu1 %v3035_v14  ;;  %v3129_v14 = vld [vmem:[#allocation13 + $0xc8] sm:$0xf] }
 0x129   : > { %v1263_v20 = vsel %vm1261_vm1, %v1245_v18, %v1260_v19  ;;  %v1590_v18 = vld [vmem:[%s5181_s9 + $0x78] sm:$0xff]  ;;  %v1589_v19 = vld [vmem:[%s5181_s9 + $0x70] sm:$0xff]  ;;  %v3130_v32 = vor.u32 %v3487_v22, %v3129_v14 }
 0x12a   : > { %3023 = vmatmul.msk.f32.vlgmr.msra.gmra.mxu3 %vm1238_vm2, %v1263_v20 }
 0x12b   : > { %1608 = vmatpush.msrb.mxu3 %v1590_v18  ;;  %v1903_v18 = vpack.c.b16 %v1887_v10, %v1887_v10 }
 0x12d   : > { %1609 = vmatpush.msrb.mxu3 %v1589_v19  ;;  %v3475_v19 = vld [vmem:[#allocation13 + $0x64] sm:$0xf0] }
 0x12f   : > { %1610 = vmatpush.msrb.mxu3 %v1588_v23  ;;  %v3486_v23 = vld [vmem:[#allocation13 + $0xcc] sm:$0xf] }
 0x131   : > { %1611 = vmatpush.msrb.mxu3 %v1587_v26  ;;  %v1925_v26 = vsel %vm1540_vm4, %v1903_v18, 0 }
 0x133   : > { %1612 = vmatpush.msrb.mxu3 %v1586_v28 }
 0x135   : > { %1613 = vmatpush.msrb.mxu3 %v1585_v30  ;;  %v3187_v30 = vld [vmem:[#allocation13 + $0x50] sm:$0xf] }
 0x137   : > { %1614 = vmatpush.msrb.mxu3 %v1584_v33 }
 0x139   : > { %1615 = vmatpush.msrb.mxu3 %v1583_v38  ;;  %v3485_v38 = vld [vmem:[#allocation13 + $0xbc] sm:$0xf0] }
 0x13a   : > { %v3122_v47 = vor.u32 %v3485_v38, %v3121_v27  ;;  %v3099_v27 = vld [vmem:[#allocation13 + $0x90] sm:$0xf0]  ;;  %v3165_v38 = vld [vmem:[#allocation13 + $0x28] sm:$0xf0] }
 0x13b   : > { %1616 = vmatpush.msrb.mxu3 %v1582_v40  ;;  %v3123_v40 = vld [vmem:[#allocation13 + $0xc0] sm:$0xf0] }
 0x13d   : > { %1617 = vmatpush.msrb.mxu3 %v1581_v49  ;;  %v3471_v49 = vld [vmem:[#allocation13 + $0x44] sm:$0xf0] }
 0x13f   : > { %1618 = vmatpush.msrb.mxu3 %v1580_v51  ;;  %v3181_v51 = vld [vmem:[#allocation13 + $0x48] sm:$0xf0] }
 0x141   : > { %1619 = vmatpush.msrb.mxu3 %v1579_v53  ;;  %v3482_v53 = vld [vmem:[#allocation13 + $0xac] sm:$0xf] }
 0x142   : > { %v3118_v6 = vor.u32 %v3482_v53, %v3115_v54 }
 0x143   : > { %1620 = vmatpush.msrb.mxu3 %v1578_v55 }
 0x145   : > { %1621 = vmatpush.msrb.mxu3 %v1577_v59 }
 0x147   : > { %1622 = vmatpush.msrb.mxu3 %v1576_v62 }
 0x149   : > { %1623 = vmatpush.msrb.mxu3 %v1575_v0 }
 0x14b   : > { %1940 = vmatpush.bf16.msra.mxu3 %v1925_v26  ;;  %v3478_v26 = vld [vmem:[#allocation13 + $0x8c] sm:$0xf] }
 0x18f   : > { %v1314_v56 = vpop.f32.mrf.mxu2 }
 0x1ad   : > { %v1334_v57 = vpop.f32.mrf.mxu3 }
 0x1ae   : > { %v1335_v11 = vadd.f32 %v1334_v57, %v1314_v56  ;;  %v1793_v56 = vpack.c.b16 %v1777_v5, %v1777_v5  ;;  %v3488_v57 = vld [vmem:[#allocation13 + $0xdc] sm:$0xf]  ;;  %v3184_v5 = vor.u32 %v3470_v50, %v3181_v51  ;;  %v3091_v50 = vld [vmem:[#allocation13 + $0x80] sm:$0xf0] }
 0x1b0   : > { %v1337_v15 = vmul.f32 0.0052083335, %v1335_v11  ;;  %v1812_v11 = vsel %vm1540_vm4, %v1792_v7, 0  ;;  %v1815_v12 = vsel %vm1540_vm4, %v1793_v56, 0  ;;  %v3481_v7 = vld [vmem:[#allocation13 + $0x9c] sm:$0xf0] }
 0x1b1   : > { %v3171_v56 = vld [vmem:[#allocation13 + $0x30] sm:$0xf] }
 0x1b2   : > { %v1338_v16 = vmul.f32 %v1337_v15, %v1337_v15 }
 0x1b4   : > { %v1340_v17 = vrot.slane %v1338_v16, 7  ;;  %v3142_v16 = vor.u32 %v3488_v57, %v3139_v61  ;;  %v3469_v57 = vld [vmem:[#allocation13 + $0x34] sm:$0xf0] }
 0x1b6   : > { %v1342_v20 = vsub.f32 %v1337_v15, %v1340_v17  ;;  %v1902_v17 = vpack.c.b16 %v1886_v9, %v1886_v9 }
 0x1b8   : > { %v1343_v24 = vadd.f32 1e-05, %v1342_v20  ;;  %v3474_v20 = vld [vmem:[#allocation13 + $0x64] sm:$0xf]  ;;  %v1922_v25 = vsel %vm1540_vm4, %v1902_v17, 0 }
 0x1b9   : > { %1927 = vmatpush.bf16.msra.mxu2 %v1922_v25  ;;  %v3200_v29 = vor.u32 %v3474_v20, %v3197_v21  ;;  %v3172_v20 = vor.u32 %v3469_v57, %v3171_v56  ;;  %v1717_v21 = vld [vmem:[#allocation13 + $0x160] sm:$0xff]  ;;  %v3464_v56 = vld [vmem:[#allocation13 + $0x14] sm:$0xf] }
 0x1ba   : > { %3667 = vrsqrt.f32 %v1343_v24  ;;  %vm1350_vm6 = vweird.f32 %v1343_v24 }
 0x1bb   : > { %1941 = vmatpush.bf16.msra.mxu3 %v3200_v29  ;;  %v3163_v29 = vld [vmem:[#allocation13 + $0x20] sm:$0xf] }
 0x1c0   : > { %v3668_v35 = vpop.eup %3667 }
 0x1c1   : > { %v1345_v37 = vmul.f32 %v3668_v35, %v1343_v24  ;;  %vm1351_vm5 = vweird.f32 %v3668_v35  ;;  %v3131_v24 = vld [vmem:[#allocation13 + $0xd0] sm:$0xf0] }
 0x1c2   : > { %vm1352_vm7 = vmor %vm1350_vm6, %vm1351_vm5  ;;  %v3134_v33 = vor.u32 %v3486_v23, %v3131_v24  ;;  %v3479_v23 = vld [vmem:[#allocation13 + $0x8c] sm:$0xf0] }
 0x1c3   : > { %v1346_v39 = vmul.f32 %v3668_v35, %v1345_v37  ;;  %v3189_v37 = vld [vmem:[#allocation13 + $0x58] sm:$0xf0] }
 0x1c5   : > { %v1347_v41 = vmul.f32 0.5, %v1346_v39  ;;  %v3484_v39 = vld [vmem:[#allocation13 + $0xbc] sm:$0xf] }
 0x1c7   : > { %v1348_v42 = vsub.f32 1.5, %v1347_v41  ;;  %v4889_v41 = vld [vmem:[#allocation5] sm:$0x3] }
 0x1c8   : > { %v1420_v58 = vperm.slane %v4889_v41, 0  ;;  %v1421_v60 = vperm.slane %v4889_v41, 1 }
 0x1c9   : > { %v1349_v44 = vmul.f32 %v3668_v35, %v1348_v42  ;;  %v4891_v42 = vld [vmem:[#allocation7] sm:$0x3] }
 0x1ca   : > { %v1428_v62 = vperm.slane %v4891_v42, 0  ;;  %v1429_v14 = vperm.slane %v4891_v42, 1 }
 0x1cb   : > { %v1353_v45 = vsel %vm1352_vm7, %v3668_v35, %v1349_v44  ;;  %v3473_v35 = vld [vmem:[#allocation13 + $0x54] sm:$0xf0] }
 0x1cc   : > { %v1354_v46 = vsel %vm1261_vm1, %v1337_v15, %v1353_v45  ;;  %v3195_v15 = vld [vmem:[#allocation13 + $0x60] sm:$0xf]  ;;  %v3188_v44 = vor.u32 %v3473_v35, %v3187_v30  ;;  %v3192_v45 = vor.u32 %v3472_v36, %v3189_v37  ;;  %v1998_v35 = vunpack.c.h.b16 %v1717_v21  ;;  %v3467_v36 = vld [vmem:[#allocation13 + $0x24] sm:$0xf0]  ;;  %v3466_v37 = vld [vmem:[#allocation13 + $0x24] sm:$0xf] }
 0x1cd   : > { %3025 = vmatmul.msk.f32.vlgmr.msra.gmra.mxu0 %vm1359_vm8, %v1354_v46  ;;  %3027 = vmatmul.msk.f32.vlgmr.msra.gmra.mxu1 %vm1359_vm8, %v1354_v46  ;;  %v3196_v28 = vor.u32 %v3475_v19, %v3195_v15  ;;  %v3179_v46 = vld [vmem:[#allocation13 + $0x40] sm:$0xf]  ;;  %v3468_v15 = vld [vmem:[#allocation13 + $0x34] sm:$0xf]  ;;  %v1452_v19 = vperm.slane %v1449_v1, 1  ;;  %v3164_v51 = vor.u32 %v3467_v36, %v3163_v29  ;;  %v3168_v52 = vor.u32 %v3466_v37, %v3165_v38 }
 0x1ce   : > { %1817 = vmatpush.bf16.msra.mxu0 %v1812_v11  ;;  %1830 = vmatpush.bf16.msra.mxu1 %v1815_v12  ;;  %v3180_v3 = vor.u32 %v3471_v49, %v3179_v46  ;;  %v3480_v11 = vld [vmem:[#allocation13 + $0x9c] sm:$0xf]  ;;  %v3107_v12 = vld [vmem:[#allocation13 + $0xa0] sm:$0xf0]  ;;  %v2014_v54 = vpack.c.b16 %v1998_v35, %v1998_v35  ;;  %v3517_v35 = vld [vmem:[#allocation13 + $0x1cc] sm:$0xf0] }
 0x1cf   : > { %1928 = vmatpush.bf16.msra.mxu2 %v3196_v28  ;;  %1942 = vmatpush.bf16.msra.mxu3 %v3192_v45  ;;  %v3110_v22 = vor.u32 %v3480_v11, %v3107_v12  ;;  %v3089_v45 = vld [vmem:[#allocation13 + $0x78] sm:$0xf]  ;;  %v3476_v49 = vld [vmem:[#allocation13 + $0x7c] sm:$0xf]  ;;  %v3500_v11 = vld [vmem:[#allocation13 + $0x144] sm:$0xf] }
 0x1d0   : > { %v3516_v36 = vld [vmem:[#allocation13 + $0x1cc] sm:$0xf]  ;;  %v3313_v38 = vld [vmem:[#allocation13 + $0x1d0] sm:$0xf0] }
 0x1d2   : > { %1818 = vmatpush.bf16.msra.mxu0 %v3138_v13  ;;  %1831 = vmatpush.bf16.msra.mxu1 %v3142_v16  ;;  %v1451_v13 = vperm.slane %v1449_v1, 0  ;;  %v3173_v16 = vld [vmem:[#allocation13 + $0x38] sm:$0xf0]  ;;  %v3503_v1 = vld [vmem:[#allocation13 + $0x154] sm:$0xf0] }
 0x1d3   : > { %1929 = vmatpush.bf16.msra.mxu2 %v3188_v44  ;;  %1943 = vmatpush.bf16.msra.mxu3 %v3184_v5  ;;  %v3176_v28 = vor.u32 %v3468_v15, %v3173_v16  ;;  %v3102_v44 = vor.u32 %v3478_v26, %v3099_v27  ;;  %v3255_v5 = vld [vmem:[#allocation13 + $0x158] sm:$0xf0]  ;;  %v3147_v16 = vld [vmem:[#allocation13] sm:$0xf]  ;;  %v3498_v26 = vld [vmem:[#allocation13 + $0x134] sm:$0xf] }
 0x1d5   : > { %3084 = vmatmul.msk.bf16.vlgmr.msrb.gmra.mxu0 %vm1536_vm10, %v1460_v48  ;;  %3085 = vmatmul.msk.bf16.vlgmr.msrb.gmra.mxu1 %vm1536_vm10, %v1460_v48  ;;  %v3126_v48 = vor.u32 %v3484_v39, %v3123_v40 }
 0x1d6   : > { %1819 = vmatpush.bf16.msra.mxu0 %v3130_v32  ;;  %1832 = vmatpush.bf16.msra.mxu1 %v3134_v33  ;;  %v1997_v33 = vunpack.c.l.b16 %v1717_v21 }
 0x1d7   : > { %1930 = vmatpush.bf16.msra.mxu2 %v3180_v3  ;;  %1944 = vmatpush.bf16.msra.mxu3 %v3176_v28  ;;  %v3239_v28 = vld [vmem:[#allocation13 + $0x138] sm:$0xf0] }
 0x1d8   : > { %v2013_v53 = vpack.c.b16 %v1997_v33, %v1997_v33  ;;  %v3311_v33 = vld [vmem:[#allocation13 + $0x1c8] sm:$0xf] }
 0x1d9   : > { %v3312_v37 = vor.u32 %v3517_v35, %v3311_v33 }
 0x1da   : > { %1820 = vmatpush.bf16.msra.mxu0 %v3122_v47  ;;  %1833 = vmatpush.bf16.msra.mxu1 %v3126_v48  ;;  %v3477_v48 = vld [vmem:[#allocation13 + $0x7c] sm:$0xf0] }
 0x1db   : > { %1931 = vmatpush.bf16.msra.mxu2 %v3172_v20  ;;  %1945 = vmatpush.bf16.msra.mxu3 %v3168_v52  ;;  %v3495_v52 = vld [vmem:[#allocation13 + $0x114] sm:$0xf0] }
 0x1de   : > { %1821 = vmatpush.bf16.msra.mxu0 %v3114_v31  ;;  %1834 = vmatpush.bf16.msra.mxu1 %v3118_v6  ;;  %v3155_v6 = vld [vmem:[#allocation13 + $0x10] sm:$0xf] }
 0x1df   : > { %1932 = vmatpush.bf16.msra.mxu2 %v3164_v51  ;;  %v3221_v51 = vld [vmem:[#allocation13 + $0x110] sm:$0xf] }
 0x1e2   : > { %1835 = vmatpush.bf16.msra.mxu1 %v3110_v22 }
 0x1e6   : > { %1836 = vmatpush.bf16.msra.mxu1 %v3102_v44  ;;  %v3231_v44 = vld [vmem:[#allocation13 + $0x128] sm:$0xf0] }
 0x24a   : > { %v1387_v55 = vpop.f32.mrf.mxu0  ;;  %v1407_v59 = vpop.f32.mrf.mxu1 }
 0x24b   : > { %v1410_v63 = vperm.slane %v1387_v55, 0  ;;  %v1411_v0 = vperm.slane %v1407_v59, 0  ;;  %v1414_v8 = vperm.slane %v1387_v55, 1  ;;  %v1415_v10 = vperm.slane %v1407_v59, 1 }
 0x24c   : > { %v3090_v55 = vor.u32 %v3477_v48, %v3089_v45  ;;  %v3514_v48 = vld [vmem:[#allocation13 + $0x1bc] sm:$0xf] }
 0x24d   : > { %v1412_v61 = vsub.f32 %v4752_v34, %v1410_v63  ;;  %v1413_v9 = vsub.f32 %v4777_v4, %v1411_v0  ;;  %v3106_v34 = vor.u32 %v3481_v7, %v3105_v2  ;;  %v3097_v4 = vld [vmem:[#allocation13 + $0x88] sm:$0xf]  ;;  %v2036_v63 = vsel %vm1540_vm4, %v2014_v54, 0  ;;  %v3253_v0 = vld [vmem:[#allocation13 + $0x150] sm:$0xf] }
 0x24e   : > { %v3098_v43 = vor.u32 %v3479_v23, %v3097_v4  ;;  %v3502_v2 = vld [vmem:[#allocation13 + $0x154] sm:$0xf]  ;;  %v3254_v3 = vor.u32 %v3503_v1, %v3253_v0  ;;  %v3465_v7 = vld [vmem:[#allocation13 + $0x14] sm:$0xf0]  ;;  %v3222_v54 = vor.u32 %v3495_v52, %v3221_v51 }
 0x24f   : > { %v1416_v17 = vmul.f32 %v1414_v8, %v1412_v61  ;;  %v1417_v18 = vmul.f32 %v1415_v10, %v1413_v9  ;;  %1822 = vmatpush.bf16.msra.mxu0 %v3106_v34  ;;  %v3258_v31 = vor.u32 %v3502_v2, %v3255_v5  ;;  %v3156_v57 = vor.u32 %v3465_v7, %v3155_v6  ;;  %v3157_v61 = vld [vmem:[#allocation13 + $0x18] sm:$0xf0]  ;;  %v3245_v9 = vld [vmem:[#allocation13 + $0x140] sm:$0xf]  ;;  %v3501_v10 = vld [vmem:[#allocation13 + $0x144] sm:$0xf0] }
 0x250   : > { %v3160_v8 = vor.u32 %v3464_v56, %v3157_v61  ;;  %v3246_v12 = vor.u32 %v3501_v10, %v3245_v9  ;;  %v3149_v34 = vld [vmem:[#allocation13 + $0x8] sm:$0xf0]  ;;  %v3297_v0 = vld [vmem:[#allocation13 + $0x1b0] sm:$0xf0]  ;;  %v3493_v5 = vld [vmem:[#allocation13 + $0x104] sm:$0xf0] }
 0x251   : > { %v1424_v24 = vmul.f32 %v1420_v58, %v1416_v17  ;;  %v1425_v25 = vmul.f32 %v1421_v60, %v1417_v18  ;;  %v3094_v58 = vor.u32 %v3476_v49, %v3091_v50  ;;  %1933 = vmatpush.bf16.msra.mxu2 %v3156_v57  ;;  %v3463_v17 = vld [vmem:[#allocation13 + $0x4] sm:$0xf0]  ;;  %v3462_v18 = vld [vmem:[#allocation13 + $0x4] sm:$0xf]  ;;  %v3215_v7 = vld [vmem:[#allocation13 + $0x108] sm:$0xf0] }
 0x252   : > { %v1556_v30 = vpop.f32.mrf.mxu0  ;;  %v1569_v32 = vpop.f32.mrf.mxu1  ;;  %1946 = vmatpush.bf16.msra.mxu3 %v3160_v8  ;;  %v3148_v21 = vor.u32 %v3463_v17, %v3147_v16  ;;  %v3152_v22 = vor.u32 %v3462_v18, %v3149_v34  ;;  %v3305_v50 = vld [vmem:[#allocation13 + $0x1c0] sm:$0xf0]  ;;  %v3287_v57 = vld [vmem:[#allocation13 + $0x198] sm:$0xf]  ;;  %v3511_v61 = vld [vmem:[#allocation13 + $0x19c] sm:$0xf0] }
 0x253   : > { %v1432_v39 = vadd.f32 %v1428_v62, %v1424_v24  ;;  %v1557_v40 = vadd.f32 %v1556_v30, %v1451_v13  ;;  %v1433_v41 = vadd.f32 %v1429_v14, %v1425_v25  ;;  %v1570_v42 = vadd.f32 %v1569_v32, %v1452_v19  ;;  %1823 = vmatpush.bf16.msra.mxu0 %v3098_v43  ;;  %v3247_v13 = vld [vmem:[#allocation13 + $0x148] sm:$0xf0]  ;;  %v1732_v14 = vld [vmem:[#allocation13 + $0x1d8] sm:$0xff]  ;;  %v3237_v24 = vld [vmem:[#allocation13 + $0x130] sm:$0xf] }
 0x254   : > { %v2033_v62 = vsel %vm1540_vm4, %v2013_v53, 0  ;;  %1837 = vmatpush.bf16.msra.mxu1 %v3094_v58  ;;  %v3250_v15 = vor.u32 %v3500_v11, %v3247_v13  ;;  %v2109_v19 = vunpack.c.l.b16 %v1732_v14  ;;  %v2110_v20 = vunpack.c.h.b16 %v1732_v14  ;;  %v3499_v25 = vld [vmem:[#allocation13 + $0x134] sm:$0xf0]  ;;  %v3496_v43 = vld [vmem:[#allocation13 + $0x124] sm:$0xf] }
 0x255   : > { %v1573_v46 = vadd.f32 %v1557_v40, %v1432_v39  ;;  %v1574_v47 = vadd.f32 %v1570_v42, %v1433_v41  ;;  %1934 = vmatpush.bf16.msra.mxu2 %v3148_v21  ;;  %v3238_v27 = vor.u32 %v3499_v25, %v3237_v24  ;;  %v3242_v32 = vor.u32 %v3498_v26, %v3239_v28  ;;  %v3229_v39 = vld [vmem:[#allocation13 + $0x120] sm:$0xf]  ;;  %v3497_v40 = vld [vmem:[#allocation13 + $0x124] sm:$0xf0]  ;;  %v3223_v58 = vld [vmem:[#allocation13 + $0x118] sm:$0xf0] }
 0x256   : > { %v2125_v4 = vpack.c.b16 %v2109_v19, %v2109_v19  ;;  %v2126_v23 = vpack.c.b16 %v2110_v20, %v2110_v20  ;;  %1947 = vmatpush.bf16.msra.mxu3 %v3152_v22  ;;  %v3316_v41 = vor.u32 %v3516_v36, %v3313_v38  ;;  %v3230_v42 = vor.u32 %v3497_v40, %v3229_v39  ;;  %v3510_v9 = vld [vmem:[#allocation13 + $0x19c] sm:$0xf]  ;;  %v3289_v10 = vld [vmem:[#allocation13 + $0x1a0] sm:$0xf0]  ;;  %v3205_v11 = vld [vmem:[#allocation13 + $0xf0] sm:$0xf] }
 0x257   : > { %1624 = vmatmul.f32.vlgmr.msrb.gmra.mxu3 %v1573_v46  ;;  %3086 = vmatmul.msk.f32.vlgmr.msrb.gmra.mxu2 %vm1238_vm2, %v1574_v47  ;;  %v3234_v45 = vor.u32 %v3496_v43, %v3231_v44  ;;  %v3303_v46 = vld [vmem:[#allocation13 + $0x1b8] sm:$0xf]  ;;  %v3515_v47 = vld [vmem:[#allocation13 + $0x1bc] sm:$0xf0]  ;;  %v3308_v53 = vor.u32 %v3514_v48, %v3305_v50  ;;  %v3288_v8 = vor.u32 %v3511_v61, %v3287_v57  ;;  %v3490_v14 = vld [vmem:[#allocation13 + $0xf4] sm:$0xf] }
 0x258   : > { %1824 = vmatpush.bf16.msra.mxu0 %v3090_v55  ;;  %2051 = vmatpush.bf16.msrb.mxu1 %v2036_v63  ;;  %v2145_v29 = vsel %vm1540_vm4, %v2125_v4, 0  ;;  %v2148_v30 = vsel %vm1540_vm4, %v2126_v23, 0  ;;  %v3304_v49 = vor.u32 %v3515_v47, %v3303_v46  ;;  %v3494_v55 = vld [vmem:[#allocation13 + $0x114] sm:$0xf]  ;;  %v3512_v63 = vld [vmem:[#allocation13 + $0x1ac] sm:$0xf] }
 0x259   : > { %2150 = vmatpush.bf16.msrb.mxu2 %v2145_v29  ;;  %v3300_v2 = vor.u32 %v3512_v63, %v3297_v0  ;;  %v3491_v13 = vld [vmem:[#allocation13 + $0xf4] sm:$0xf0]  ;;  %v3279_v18 = vld [vmem:[#allocation13 + $0x188] sm:$0xf]  ;;  %v3509_v19 = vld [vmem:[#allocation13 + $0x18c] sm:$0xf0] }
 0x25a   : > { %v1558_v59 = vpop.f32.mrf.mxu0  ;;  %v1571_v60 = vpop.f32.mrf.mxu1  ;;  %2163 = vmatpush.bf16.msrb.mxu3 %v2148_v30  ;;  %v3206_v16 = vor.u32 %v3491_v13, %v3205_v11  ;;  %v3508_v20 = vld [vmem:[#allocation13 + $0x18c] sm:$0xf]  ;;  %v3280_v21 = vor.u32 %v3509_v19, %v3279_v18  ;;  %v3281_v34 = vld [vmem:[#allocation13 + $0x190] sm:$0xf0]  ;;  %v3271_v4 = vld [vmem:[#allocation13 + $0x178] sm:$0xf] }
 0x25b   : > { %v3295_v59 = vld [vmem:[#allocation13 + $0x1a8] sm:$0xf]  ;;  %v3226_v60 = vor.u32 %v3494_v55, %v3223_v58  ;;  %v3284_v22 = vor.u32 %v3508_v20, %v3281_v34  ;;  %v3507_v23 = vld [vmem:[#allocation13 + $0x17c] sm:$0xf0]  ;;  %v3506_v24 = vld [vmem:[#allocation13 + $0x17c] sm:$0xf] }
 0x25c   : > { %2038 = vmatpush.bf16.msrb.mxu0 %v2033_v62  ;;  %2052 = vmatpush.bf16.msrb.mxu1 %v3258_v31  ;;  %v3513_v62 = vld [vmem:[#allocation13 + $0x1ac] sm:$0xf0]  ;;  %v3492_v31 = vld [vmem:[#allocation13 + $0x104] sm:$0xf]  ;;  %v3272_v25 = vor.u32 %v3507_v23, %v3271_v4  ;;  %v3504_v30 = vld [vmem:[#allocation13 + $0x16c] sm:$0xf] }
 0x25d   : > { %2151 = vmatpush.bf16.msrb.mxu2 %v3312_v37  ;;  %v3296_v1 = vor.u32 %v3513_v62, %v3295_v59  ;;  %v3218_v56 = vor.u32 %v3492_v31, %v3215_v7  ;;  %v3273_v26 = vld [vmem:[#allocation13 + $0x180] sm:$0xf0]  ;;  %v3505_v29 = vld [vmem:[#allocation13 + $0x16c] sm:$0xf0]  ;;  %v2232_v55 = vld [vmem:[%s5188_s16 + $0x68] sm:$0xff] }
 0x25e   : > { %2164 = vmatpush.bf16.msrb.mxu3 %v3316_v41  ;;  %v3276_v28 = vor.u32 %v3506_v24, %v3273_v26  ;;  %v2248_v58 = vld [vmem:[%s5188_s16 + $0xe8] sm:$0xff]  ;;  %v2231_v59 = vld [vmem:[%s5188_s16 + $0x60] sm:$0xff]  ;;  %v2246_v62 = vld [vmem:[%s5188_s16 + $0xd8] sm:$0xff] }
 0x25f   : > { %v2230_v63 = vld [vmem:[%s5188_s16 + $0x58] sm:$0xff]  ;;  %v2244_v31 = vld [vmem:[%s5188_s16 + $0xc8] sm:$0xff]  ;;  %v2243_v7 = vld [vmem:[%s5188_s16 + $0xc0] sm:$0xff] }
 0x260   : > { %2039 = vmatpush.bf16.msrb.mxu0 %v3254_v3  ;;  %2053 = vmatpush.bf16.msrb.mxu1 %v3250_v15  ;;  %v3213_v3 = vld [vmem:[#allocation13 + $0x100] sm:$0xf]  ;;  %v3207_v15 = vld [vmem:[#allocation13 + $0xf8] sm:$0xf0]  ;;  %v2224_v11 = vld [vmem:[%s5188_s16 + $0x28] sm:$0xff] }
 0x261   : > { %2152 = vmatpush.bf16.msrb.mxu2 %v3304_v49  ;;  %v3214_v6 = vor.u32 %v3493_v5, %v3213_v3  ;;  %v3210_v17 = vor.u32 %v3490_v14, %v3207_v15  ;;  %v2245_v3 = vld [vmem:[%s5188_s16 + $0xd0] sm:$0xff]  ;;  %v2228_v5 = vld [vmem:[%s5188_s16 + $0x48] sm:$0xff]  ;;  %v2242_v57 = vld [vmem:[%s5188_s16 + $0xb8] sm:$0xff] }
 0x262   : > { %2165 = vmatpush.bf16.msrb.mxu3 %v3308_v53  ;;  %v2234_v53 = vld [vmem:[%s5188_s16 + $0x78] sm:$0xff]  ;;  %v2223_v13 = vld [vmem:[%s5188_s16 + $0x20] sm:$0xff]  ;;  %v2237_v18 = vld [vmem:[%s5188_s16 + $0x90] sm:$0xff] }
 0x263   : > { %v2239_v14 = vld [vmem:[%s5188_s16 + $0xa0] sm:$0xff]  ;;  %v2222_v15 = vld [vmem:[%s5188_s16 + $0x18] sm:$0xff]  ;;  %v2236_v34 = vld [vmem:[%s5188_s16 + $0x88] sm:$0xff] }
 0x264   : > { %2040 = vmatpush.bf16.msrb.mxu0 %v3246_v12  ;;  %2054 = vmatpush.bf16.msrb.mxu1 %v3242_v32  ;;  %v3292_v12 = vor.u32 %v3510_v9, %v3289_v10  ;;  %v3265_v32 = vld [vmem:[#allocation13 + $0x170] sm:$0xf0]  ;;  %v2219_v23 = vld [vmem:[%s5188_s16] sm:$0xff] }
 0x265   : > { %2153 = vmatpush.bf16.msrb.mxu2 %v3296_v1  ;;  %v3268_v38 = vor.u32 %v3504_v30, %v3265_v32  ;;  %v2225_v9 = vld [vmem:[%s5188_s16 + $0x30] sm:$0xff]  ;;  %v2235_v24 = vld [vmem:[%s5188_s16 + $0x80] sm:$0xff] }
 0x266   : > { %2166 = vmatpush.bf16.msrb.mxu3 %v3300_v2  ;;  %v2229_v2 = vld [vmem:[%s5188_s16 + $0x50] sm:$0xff]  ;;  %v2178_v32 = vld [vmem:[%s5183_s11] sm:$0x3] }
 0x267   : > { %v2241_v10 = vld [vmem:[%s5188_s16 + $0xb0] sm:$0xff] }
 0x268   : > { %2041 = vmatpush.bf16.msrb.mxu0 %v3238_v27  ;;  %2055 = vmatpush.bf16.msrb.mxu1 %v3234_v45  ;;  %v3263_v27 = vld [vmem:[#allocation13 + $0x168] sm:$0xf] }
 0x269   : > { %2154 = vmatpush.bf16.msrb.mxu2 %v3288_v8  ;;  %v3264_v37 = vor.u32 %v3505_v29, %v3263_v27 }
 0x26a   : > { %2167 = vmatpush.bf16.msrb.mxu3 %v3292_v12  ;;  %v2240_v12 = vld [vmem:[%s5188_s16 + $0xa8] sm:$0xff] }
 0x26c   : > { %2042 = vmatpush.bf16.msrb.mxu0 %v3230_v42  ;;  %2056 = vmatpush.bf16.msrb.mxu1 %v3226_v60  ;;  %v2247_v60 = vld [vmem:[%s5188_s16 + $0xe0] sm:$0xff] }
 0x26d   : > { %2155 = vmatpush.bf16.msrb.mxu2 %v3280_v21  ;;  %v2220_v21 = vld [vmem:[%s5188_s16 + $0x8] sm:$0xff] }
 0x26e   : > { %2168 = vmatpush.bf16.msrb.mxu3 %v3284_v22 }
 0x270   : > { %2043 = vmatpush.bf16.msrb.mxu0 %v3222_v54  ;;  %2057 = vmatpush.bf16.msrb.mxu1 %v3218_v56  ;;  %v2233_v54 = vld [vmem:[%s5188_s16 + $0x70] sm:$0xff]  ;;  %v2226_v56 = vld [vmem:[%s5188_s16 + $0x38] sm:$0xff] }
 0x271   : > { %2156 = vmatpush.bf16.msrb.mxu2 %v3272_v25 }
 0x272   : > { %2169 = vmatpush.bf16.msrb.mxu3 %v3276_v28 }
 0x274   : > { %2044 = vmatpush.bf16.msrb.mxu0 %v3214_v6  ;;  %2058 = vmatpush.bf16.msrb.mxu1 %v3210_v17  ;;  %v2227_v6 = vld [vmem:[%s5188_s16 + $0x40] sm:$0xff]  ;;  %v2221_v17 = vld [vmem:[%s5188_s16 + $0x10] sm:$0xff] }
 0x275   : > { %2157 = vmatpush.bf16.msrb.mxu2 %v3264_v37  ;;  %v2181_v37 = vperm.slane %v2178_v32, 1 }
 0x276   : > { %2170 = vmatpush.bf16.msrb.mxu3 %v3268_v38 }
 0x278   : > { %2045 = vmatpush.bf16.msrb.mxu0 %v3206_v16  ;;  %v2238_v16 = vld [vmem:[%s5188_s16 + $0x98] sm:$0xff] }
 0x2da   : > { %v1625_v33 = vpop.f32.mrf.mxu3  ;;  %v1645_v35 = vpop.f32.mrf.mxu2 }
 0x2db   : > { %v1646_v36 = vadd.f32 %v1645_v35, %v1625_v33  ;;  %v2180_v35 = vperm.slane %v2178_v32, 0  ;;  %v3529_v32 = vld [vmem:[#allocation14 + $0x54] sm:$0xf0] }
 0x2dd   : > { %3669 = vtanh.f32 %v1646_v36 }
 0x2e3   : > { %v3670_v39 = vpop.eup %3669 }
 0x2e4   : > { %v4904_v40 = vpack.c.bf16 %v3670_v39, %v3670_v39 }
 0x2e6   : > { %v1651_v41 = vunpack.c.l.b16 %v4904_v40  ;;  %3143 = vmatmul.msk.bf16.vlgmr.msra.gmra.mxu0 %vm1536_vm10, %v4904_v40  ;;  %3144 = vmatmul.msk.bf16.vlgmr.msra.gmra.mxu1 %vm1536_vm10, %v4904_v40 }
 0x2e7   : > { %2252 = vmatpush.msra.mxu0 %v2234_v53  ;;  %2274 = vmatpush.msra.mxu1 %v2248_v58 }
 0x2e8   : > { %v1652_v42 = vpack.c.b16 %v1651_v41, %v1651_v41 }
 0x2e9   : > { %2253 = vmatpush.msra.mxu0 %v2233_v54  ;;  %2275 = vmatpush.msra.mxu1 %v2247_v60 }
 0x2ea   : > { %v1654_v43 = vshrl.u32 %v1652_v42, 16  ;;  %v1657_v44 = vshll.u32 %v1652_v42, 16  ;;  %v1953_v49 = vrot.slane %v1652_v42, 2 }
 0x2eb   : > { %2254 = vmatpush.msra.mxu0 %v2232_v55  ;;  %2276 = vmatpush.msra.mxu1 %v2246_v62 }
 0x2ec   : > { %v1656_v45 = vrot.slane %v1654_v43, 1  ;;  %v1659_v46 = vrot.slane %v1657_v44, 2  ;;  %v1666_v50 = vrot.slane %v1657_v44, 1 }
 0x2ed   : > { %2255 = vmatpush.msra.mxu0 %v2231_v59  ;;  %2277 = vmatpush.msra.mxu1 %v2245_v3 }
 0x2ee   : > { %v1660_v47 = vor.u32 %v1659_v46, %v1656_v45  ;;  %v1667_v51 = vor.u32 %v1666_v50, %v1654_v43 }
 0x2ef   : > { %2256 = vmatpush.msra.mxu0 %v2230_v63  ;;  %2278 = vmatpush.msra.mxu1 %v2244_v31 }
 0x2f0   : > { %v1665_v48 = vsel %vm1664_vm12, 0, %v1660_v47  ;;  %v1672_v52 = vsel %vm1671_vm14, %v1667_v51, 0 }
 0x2f1   : > { %3201 = vmatmul.msk.bf16.vlgmr.msra.gmra.mxu2 %vm1536_vm10, %v1665_v48  ;;  %3202 = vmatmul.msk.bf16.vlgmr.msra.gmra.mxu3 %vm1536_vm10, %v1665_v48 }
 0x2f2   : > { %2257 = vmatpush.msra.mxu0 %v2229_v2  ;;  %2279 = vmatpush.msra.mxu1 %v2243_v7 }
 0x2f4   : > { %2258 = vmatpush.msra.mxu0 %v2228_v5  ;;  %2280 = vmatpush.msra.mxu1 %v2242_v57 }
 0x2f6   : > { %3259 = vmatmul.msk.bf16.vlgmr.msrb.gmra.mxu0 %vm1536_vm10, %v1953_v49  ;;  %3260 = vmatmul.msk.bf16.vlgmr.msrb.gmra.mxu1 %vm1536_vm10, %v1953_v49 }
 0x2f7   : > { %2259 = vmatpush.msra.mxu0 %v2227_v6  ;;  %2281 = vmatpush.msra.mxu1 %v2241_v10 }
 0x2f9   : > { %2260 = vmatpush.msra.mxu0 %v2226_v56  ;;  %2282 = vmatpush.msra.mxu1 %v2240_v12 }
 0x2fb   : > { %2261 = vmatpush.msra.mxu0 %v2225_v9  ;;  %2283 = vmatpush.msra.mxu1 %v2239_v14 }
 0x2fd   : > { %2262 = vmatpush.msra.mxu0 %v2224_v11  ;;  %2284 = vmatpush.msra.mxu1 %v2238_v16 }
 0x2ff   : > { %2263 = vmatpush.msra.mxu0 %v2223_v13  ;;  %2285 = vmatpush.msra.mxu1 %v2237_v18  ;;  %v2312_v18 = vld [vmem:[#allocation16 + $0x10] sm:$0x3] }
 0x300   : > { %3320 = vmatpush.msk.msra.mxu2 %vm1363_vm3, %v2312_v18  ;;  %v2530_v18 = vld [vmem:[%s5190_s18 + $0x68] sm:$0xff] }
 0x301   : > { %3317 = vmatmul.msk.bf16.vlgmr.msrb.gmra.mxu2 %vm1536_vm10, %v1672_v52  ;;  %3318 = vmatmul.msk.bf16.vlgmr.msrb.gmra.mxu3 %vm1536_vm10, %v1672_v52 }
 0x302   : > { %2264 = vmatpush.msra.mxu0 %v2222_v15  ;;  %2286 = vmatpush.msra.mxu1 %v2236_v34  ;;  %v2401_v15 = vld [vmem:[#allocation14 + $0x70] sm:$0xff]  ;;  %v2310_v34 = vld [vmem:[#allocation16] sm:$0xff] }
 0x303   : > { %v2451_v16 = vunpack.c.l.b16 %v2401_v15  ;;  %2338 = vmatpush.msra.mxu2 %v2310_v34  ;;  %v2543_v34 = vld [vmem:[%s5190_s18 + $0xd0] sm:$0xff] }
 0x304   : > { %2265 = vmatpush.msra.mxu0 %v2221_v17  ;;  %2287 = vmatpush.msra.mxu1 %v2235_v24  ;;  %v2452_v17 = vunpack.c.h.b16 %v2401_v15  ;;  %v3374_v24 = vld [vmem:[#allocation14 + $0x60] sm:$0xf] }
 0x306   : > { %2266 = vmatpush.msra.mxu0 %v2220_v21  ;;  %v2468_v21 = vpack.c.b16 %v2452_v17, %v2452_v17  ;;  %v2545_v17 = vld [vmem:[%s5190_s18 + $0xe0] sm:$0xff] }
 0x308   : > { %2267 = vmatpush.msra.mxu0 %v2219_v23  ;;  %v2487_v23 = vsel %vm1540_vm4, %v2468_v21, 0  ;;  %v2529_v21 = vld [vmem:[%s5190_s18 + $0x60] sm:$0xff] }
 0x363   : > { %v1826_v0 = vpop.f32.mrf.mxu0  ;;  %v1839_v1 = vpop.f32.mrf.mxu1 }
 0x36b   : > { %v1828_v61 = vpop.f32.mrf.mxu0  ;;  %v1841_v8 = vpop.f32.mrf.mxu1 }
 0x373   : > { %v2047_v19 = vpop.f32.mrf.mxu0  ;;  %v2060_v20 = vpop.f32.mrf.mxu1 }
 0x374   : > { %v1936_v22 = vpop.f32.mrf.mxu2  ;;  %v1949_v4 = vpop.f32.mrf.mxu3 }
 0x375   : > { %v1937_v29 = vadd.f32 %v1936_v22, %v1826_v0  ;;  %v1950_v30 = vadd.f32 %v1949_v4, %v1839_v1  ;;  %v2311_v22 = vld [vmem:[#allocation16 + $0x8] sm:$0xff] }
 0x377   : > { %v2064_v33 = vadd.f32 %v2047_v19, %v1937_v29  ;;  %v2065_v36 = vadd.f32 %v2060_v20, %v1950_v30  ;;  %v2313_v19 = vld [vmem:[#allocation16 + $0x18] sm:$0x3]  ;;  %v2467_v20 = vpack.c.b16 %v2451_v16, %v2451_v16  ;;  %v2546_v16 = vld [vmem:[%s5190_s18 + $0xe8] sm:$0xff] }
 0x378   : > { %3322 = vmatpush.msk.msra.mxu3 %vm1363_vm3, %v2313_v19  ;;  %v3366_v30 = vld [vmem:[#allocation14 + $0x50] sm:$0xf]  ;;  %2572 = vmatpush.msrb.mxu0 %v2546_v16 }
 0x379   : > { %v2484_v4 = vsel %vm1540_vm4, %v2467_v20, 0  ;;  %v2544_v20 = vld [vmem:[%s5190_s18 + $0xd8] sm:$0xff] }
 0x37a   : > { %2358 = vmatpush.msra.mxu3 %v2311_v22  ;;  %2489 = vmatpush.bf16.msrb.mxu2 %v2484_v4  ;;  %v2528_v22 = vld [vmem:[%s5190_s18 + $0x58] sm:$0xff]  ;;  %v2542_v4 = vld [vmem:[%s5190_s18 + $0xc8] sm:$0xff] }
 0x37b   : > { %v2049_v25 = vpop.f32.mrf.mxu0  ;;  %v2062_v26 = vpop.f32.mrf.mxu1  ;;  %2573 = vmatpush.msrb.mxu0 %v2545_v17 }
 0x37c   : > { %v1938_v27 = vpop.f32.mrf.mxu2  ;;  %v1951_v28 = vpop.f32.mrf.mxu3  ;;  %2502 = vmatpush.bf16.msrb.mxu3 %v2487_v23  ;;  %v3531_v25 = vld [vmem:[#allocation14 + $0x64] sm:$0xf0]  ;;  %v3530_v26 = vld [vmem:[#allocation14 + $0x64] sm:$0xf]  ;;  %v2527_v23 = vld [vmem:[%s5190_s18 + $0x50] sm:$0xff] }
 0x37d   : > { %v3375_v27 = vor.u32 %v3531_v25, %v3374_v24  ;;  %v3376_v28 = vld [vmem:[#allocation14 + $0x68] sm:$0xf0]  ;;  %2574 = vmatpush.msrb.mxu0 %v2544_v20  ;;  %v2541_v24 = vld [vmem:[%s5190_s18 + $0xc0] sm:$0xff] }
 0x37e   : > { %v3379_v29 = vor.u32 %v3530_v26, %v3376_v28  ;;  %v2526_v25 = vld [vmem:[%s5190_s18 + $0x48] sm:$0xff] }
 0x37f   : > { %2490 = vmatpush.bf16.msrb.mxu2 %v3375_v27  ;;  %2575 = vmatpush.msrb.mxu0 %v2543_v34  ;;  %v2540_v27 = vld [vmem:[%s5190_s18 + $0xb8] sm:$0xff] }
 0x380   : > { %2503 = vmatpush.bf16.msrb.mxu3 %v3379_v29  ;;  %v2525_v29 = vld [vmem:[%s5190_s18 + $0x40] sm:$0xff] }
 0x381   : > { %2576 = vmatpush.msrb.mxu0 %v2542_v4 }
 0x383   : > { %2577 = vmatpush.msrb.mxu0 %v2541_v24 }
 0x384   : > { %v2159_v38 = vpop.f32.mrf.mxu2  ;;  %v2172_v39 = vpop.f32.mrf.mxu3 }
 0x385   : > { %v2176_v41 = vadd.f32 %v2159_v38, %v2064_v33  ;;  %v2177_v42 = vadd.f32 %v2172_v39, %v2065_v36  ;;  %v3528_v33 = vld [vmem:[#allocation14 + $0x54] sm:$0xf]  ;;  %v3368_v36 = vld [vmem:[#allocation14 + $0x58] sm:$0xf0]  ;;  %v3358_v38 = vld [vmem:[#allocation14 + $0x40] sm:$0xf]  ;;  %2578 = vmatpush.msrb.mxu0 %v2540_v27 }
 0x386   : > { %v3527_v39 = vld [vmem:[#allocation14 + $0x44] sm:$0xf0] }
 0x387   : > { %v5012_v43 = vadd.f32 %v2180_v35, %v2176_v41  ;;  %v5014_v44 = vadd.f32 %v2181_v37, %v2177_v42  ;;  %v3367_v35 = vor.u32 %v3529_v32, %v3366_v30  ;;  %v3371_v37 = vor.u32 %v3528_v33, %v3368_v36  ;;  %v3526_v41 = vld [vmem:[#allocation14 + $0x44] sm:$0xf]  ;;  %v2524_v32 = vld [vmem:[%s5190_s18 + $0x38] sm:$0xff] }
 0x388   : > { %v3359_v42 = vor.u32 %v3527_v39, %v3358_v38  ;;  %v2523_v39 = vld [vmem:[%s5190_s18 + $0x30] sm:$0xff] }
 0x389   : > { %v2186_v45 = vsel %vm1540_vm4, %v5012_v43, 0.0  ;;  %v2201_v46 = vmul.f32 %v5012_v43, %v5012_v43  ;;  %v2194_v47 = vsel %vm2193_vm15, %v5014_v44, 0.0  ;;  %v2202_v48 = vmul.f32 %v5014_v44, %v5014_v44  ;;  %2491 = vmatpush.bf16.msrb.mxu2 %v3367_v35  ;;  %2504 = vmatpush.bf16.msrb.mxu3 %v3371_v37 }
 0x38a   : > { %v2187_v49 = vrot.slane %v2186_v45, 4  ;;  %v2195_v50 = vrot.slane %v2194_v47, 4 }
 0x38b   : > { %v2203_v51 = vsel %vm1540_vm4, %v2201_v46, 0.0  ;;  %v2210_v52 = vsel %vm2193_vm15, %v2202_v48, 0.0  ;;  %v3525_v48 = vld [vmem:[#allocation14 + $0x34] sm:$0xf0] }
 0x38c   : > { %v2188_v53 = vadd.f32 %v2187_v49, %v2186_v45  ;;  %v2204_v54 = vrot.slane %v2203_v51, 4  ;;  %v2196_v55 = vadd.f32 %v2195_v50, %v2194_v47  ;;  %v2211_v58 = vrot.slane %v2210_v52, 4  ;;  %v2161_v59 = vpop.f32.mrf.mxu2  ;;  %v2174_v60 = vpop.f32.mrf.mxu3  ;;  %v3360_v45 = vld [vmem:[#allocation14 + $0x48] sm:$0xf0]  ;;  %v3350_v47 = vld [vmem:[#allocation14 + $0x30] sm:$0xf] }
 0x38d   : > { %v3363_v46 = vor.u32 %v3526_v41, %v3360_v45  ;;  %2492 = vmatpush.bf16.msrb.mxu2 %v3359_v42  ;;  %v3524_v49 = vld [vmem:[#allocation14 + $0x34] sm:$0xf]  ;;  %v3351_v50 = vor.u32 %v3525_v48, %v3350_v47  ;;  %v3344_v59 = vld [vmem:[#allocation14 + $0x28] sm:$0xf0]  ;;  %v2520_v47 = vld [vmem:[%s5190_s18 + $0x18] sm:$0xff] }
 0x38e   : > { %v2189_v62 = vrot.slane %v2188_v53, 2  ;;  %v2205_v63 = vadd.f32 %v2204_v54, %v2203_v51  ;;  %v2197_v0 = vrot.slane %v2196_v55, 2  ;;  %v2212_v1 = vadd.f32 %v2211_v58, %v2210_v52  ;;  %v3352_v51 = vld [vmem:[#allocation14 + $0x38] sm:$0xf0]  ;;  %v3523_v54 = vld [vmem:[#allocation14 + $0x24] sm:$0xf0] }
 0x38f   : > { %2505 = vmatpush.bf16.msrb.mxu3 %v3363_v46  ;;  %v3355_v52 = vor.u32 %v3524_v49, %v3352_v51  ;;  %v2539_v41 = vld [vmem:[%s5190_s18 + $0xb0] sm:$0xff]  ;;  %v2522_v42 = vld [vmem:[%s5190_s18 + $0x28] sm:$0xff]  ;;  %v2537_v46 = vld [vmem:[%s5190_s18 + $0xa0] sm:$0xff] }
 0x390   : > { %v2198_v2 = vadd.f32 %v2197_v0, %v2196_v55  ;;  %v2213_v3 = vrot.slane %v2212_v1, 2  ;;  %v2190_v5 = vadd.f32 %v2189_v62, %v2188_v53  ;;  %v2206_v31 = vrot.slane %v2205_v63, 2  ;;  %v3342_v53 = vld [vmem:[#allocation14 + $0x20] sm:$0xf]  ;;  %v3522_v55 = vld [vmem:[#allocation14 + $0x24] sm:$0xf]  ;;  %2579 = vmatpush.msrb.mxu0 %v2539_v41 }
 0x391   : > { %2493 = vmatpush.bf16.msrb.mxu2 %v3351_v50  ;;  %v3343_v58 = vor.u32 %v3523_v54, %v3342_v53  ;;  %v3347_v60 = vor.u32 %v3522_v55, %v3344_v59  ;;  %v3334_v62 = vld [vmem:[#allocation14 + $0x10] sm:$0xf]  ;;  %v3520_v0 = vld [vmem:[#allocation14 + $0x14] sm:$0xf]  ;;  %v2538_v45 = vld [vmem:[%s5190_s18 + $0xa8] sm:$0xff] }
 0x392   : > { %v2199_v6 = vrot.slane %v2198_v2, 1  ;;  %v2214_v7 = vadd.f32 %v2213_v3, %v2212_v1  ;;  %v2191_v56 = vrot.slane %v2190_v5, 1  ;;  %v2207_v57 = vadd.f32 %v2206_v31, %v2205_v63  ;;  %v3521_v63 = vld [vmem:[#allocation14 + $0x14] sm:$0xf0]  ;;  %2580 = vmatpush.msrb.mxu0 %v2538_v45  ;;  %v2519_v49 = vld [vmem:[%s5190_s18 + $0x10] sm:$0xff]  ;;  %v2518_v51 = vld [vmem:[%s5190_s18 + $0x8] sm:$0xff] }
 0x393   : > { %2506 = vmatpush.bf16.msrb.mxu3 %v3355_v52  ;;  %v3335_v1 = vor.u32 %v3521_v63, %v3334_v62  ;;  %v2536_v48 = vld [vmem:[%s5190_s18 + $0x98] sm:$0xff]  ;;  %v2535_v50 = vld [vmem:[%s5190_s18 + $0x90] sm:$0xff]  ;;  %v2534_v52 = vld [vmem:[%s5190_s18 + $0x88] sm:$0xff] }
 0x394   : > { %v2208_v61 = vrot.slane %v2207_v57, 1  ;;  %v2215_v8 = vrot.slane %v2214_v7, 1  ;;  %v2192_v9 = vadd.f32 %v2191_v56, %v2190_v5  ;;  %v2200_v11 = vadd.f32 %v2199_v6, %v2198_v2  ;;  %v3336_v2 = vld [vmem:[#allocation14 + $0x18] sm:$0xf0]  ;;  %v3326_v6 = vld [vmem:[#allocation14] sm:$0xf]  ;;  %2581 = vmatpush.msrb.mxu0 %v2537_v46 }
 0x395   : > { %2494 = vmatpush.bf16.msrb.mxu2 %v3343_v58  ;;  %v3339_v31 = vor.u32 %v3520_v0, %v3336_v2  ;;  %v3518_v56 = vld [vmem:[#allocation14 + $0x4] sm:$0xf]  ;;  %v2371_v55 = vld [vmem:[%s5184_s12] sm:$0x3] }
 0x396   : > { %v2209_v10 = vadd.f32 %v2208_v61, %v2207_v57  ;;  %v2216_v12 = vadd.f32 %v2215_v8, %v2214_v7  ;;  %v3519_v7 = vld [vmem:[#allocation14 + $0x4] sm:$0xf0]  ;;  %v3328_v8 = vld [vmem:[#allocation14 + $0x8] sm:$0xf0]  ;;  %2582 = vmatpush.msrb.mxu0 %v2536_v48  ;;  %v2517_v53 = vld [vmem:[%s5190_s18] sm:$0xff]  ;;  %v2374_v2 = vperm.slane %v2371_v55, 1 }
 0x397   : > { %2507 = vmatpush.bf16.msrb.mxu3 %v3347_v60  ;;  %v3327_v61 = vor.u32 %v3519_v7, %v3326_v6  ;;  %v2533_v54 = vld [vmem:[%s5190_s18 + $0x80] sm:$0xff] }
 0x398   : > { %v2217_v13 = vsel %vm1261_vm1, %v2192_v9, %v2209_v10  ;;  %v2218_v14 = vsel %vm1261_vm1, %v2200_v11, %v2216_v12  ;;  %v3331_v9 = vor.u32 %v3518_v56, %v3328_v8  ;;  %2583 = vmatpush.msrb.mxu0 %v2535_v50  ;;  %v2379_v63 = vld [vmem:[%s5185_s13] sm:$0x3] }
 0x399   : > { %2268 = vmatmul.f32.vlgmr.msra.gmra.mxu0 %v2217_v13  ;;  %3319 = vmatmul.msk.f32.vlgmr.msra.gmra.mxu1 %vm1238_vm2, %v2218_v14  ;;  %v2532_v13 = vld [vmem:[%s5190_s18 + $0x78] sm:$0xff]  ;;  %v2531_v14 = vld [vmem:[%s5190_s18 + $0x70] sm:$0xff]  ;;  %v2402_v0 = vld [vmem:[%s5187_s15] sm:$0x3]  ;;  %v2381_v7 = vperm.slane %v2379_v63, 0  ;;  %v2382_v8 = vperm.slane %v2379_v63, 1 }
 0x39a   : > { %2495 = vmatpush.bf16.msrb.mxu2 %v3335_v1  ;;  %2550 = vmatpush.msrb.mxu1 %v2532_v13  ;;  %v2373_v1 = vperm.slane %v2371_v55, 0  ;;  %v2404_v56 = vperm.slane %v2402_v0, 0 }
 0x39b   : > { %2508 = vmatpush.bf16.msrb.mxu3 %v3339_v31  ;;  %2584 = vmatpush.msrb.mxu0 %v2534_v52 }
 0x39c   : > { %2551 = vmatpush.msrb.mxu1 %v2531_v14 }
 0x39d   : > { %2585 = vmatpush.msrb.mxu0 %v2533_v54 }
 0x39e   : > { %2496 = vmatpush.bf16.msrb.mxu2 %v3327_v61  ;;  %2552 = vmatpush.msrb.mxu1 %v2530_v18 }
 0x39f   : > { %2509 = vmatpush.bf16.msrb.mxu3 %v3331_v9  ;;  %v2405_v9 = vperm.slane %v2402_v0, 1 }
 0x3a0   : > { %2553 = vmatpush.msrb.mxu1 %v2529_v21 }
 0x3a2   : > { %2554 = vmatpush.msrb.mxu1 %v2528_v22 }
 0x3a4   : > { %2555 = vmatpush.msrb.mxu1 %v2527_v23 }
 0x3a6   : > { %2556 = vmatpush.msrb.mxu1 %v2526_v25 }
 0x3a8   : > { %2557 = vmatpush.msrb.mxu1 %v2525_v29 }
 0x3aa   : > { %2558 = vmatpush.msrb.mxu1 %v2524_v32 }
 0x3ac   : > { %2559 = vmatpush.msrb.mxu1 %v2523_v39 }
 0x3ae   : > { %2560 = vmatpush.msrb.mxu1 %v2522_v42 }
 0x416   : > { %v2269_v3 = vpop.f32.mrf.mxu0  ;;  %v2289_v5 = vpop.f32.mrf.mxu1 }
 0x417   : > { %v2290_v57 = vadd.f32 %v2289_v5, %v2269_v3 }
 0x419   : > { %v2292_v10 = vmul.f32 0.010416667, %v2290_v57 }
 0x41b   : > { %v2293_v11 = vmul.f32 %v2292_v10, %v2292_v10 }
 0x41d   : > { %v2295_v12 = vrot.slane %v2293_v11, 7 }
 0x41f   : > { %v2297_v15 = vsub.f32 %v2292_v10, %v2295_v12 }
 0x421   : > { %v2298_v19 = vadd.f32 1e-05, %v2297_v15 }
 0x423   : > { %3671 = vrsqrt.f32 %v2298_v19  ;;  %vm2305_vm3 = vweird.f32 %v2298_v19 }
 0x429   : > { %v3672_v26 = vpop.eup %3671 }
 0x42a   : > { %v2300_v28 = vmul.f32 %v3672_v26, %v2298_v19  ;;  %vm2306_vm0 = vweird.f32 %v3672_v26 }
 0x42b   : > { %vm2307_vm4 = vmor %vm2305_vm3, %vm2306_vm0 }
 0x42c   : > { %v2301_v30 = vmul.f32 %v3672_v26, %v2300_v28 }
 0x42e   : > { %v2302_v33 = vmul.f32 0.5, %v2301_v30 }
 0x430   : > { %v2303_v35 = vsub.f32 1.5, %v2302_v33 }
 0x432   : > { %v2304_v36 = vmul.f32 %v3672_v26, %v2303_v35 }
 0x434   : > { %v2308_v37 = vsel %vm2307_vm4, %v3672_v26, %v2304_v36 }
 0x435   : > { %v2309_v38 = vsel %vm1261_vm1, %v2292_v10, %v2308_v37  ;;  %vm2591_vm1 = vcmask 388096  }
 0x436   : > { %3321 = vmatmul.msk.f32.vlgmr.msra.gmra.mxu2 %vm1359_vm8, %v2309_v38  ;;  %3323 = vmatmul.msk.f32.vlgmr.msra.gmra.mxu3 %vm1359_vm8, %v2309_v38 }
 0x43e   : > { %3380 = vmatmul.msk.bf16.vlgmr.msrb.gmra.mxu2 %vm1536_vm10, %v4904_v40  ;;  %3381 = vmatmul.msk.bf16.vlgmr.msrb.gmra.mxu3 %vm1536_vm10, %v4904_v40  ;;  %v2521_v40 = vld [vmem:[%s5190_s18 + $0x20] sm:$0xff] }
 0x43f   : > { %2561 = vmatpush.msrb.mxu1 %v2521_v40 }
 0x441   : > { %2562 = vmatpush.msrb.mxu1 %v2520_v47 }
 0x443   : > { %2563 = vmatpush.msrb.mxu1 %v2519_v49 }
 0x445   : > { %2564 = vmatpush.msrb.mxu1 %v2518_v51 }
 0x447   : > { %2565 = vmatpush.msrb.mxu1 %v2517_v53 }
 0x4b9   : > { %v2340_v58 = vpop.f32.mrf.mxu2  ;;  %v2360_v59 = vpop.f32.mrf.mxu3 }
 0x4ba   : > { %v2363_v60 = vperm.slane %v2340_v58, 0  ;;  %v2364_v62 = vperm.slane %v2360_v59, 0  ;;  %v2367_v5 = vperm.slane %v2340_v58, 1  ;;  %v2368_v6 = vperm.slane %v2360_v59, 1 }
 0x4bc   : > { %v2365_v3 = vsub.f32 %v5012_v43, %v2363_v60  ;;  %v2366_v31 = vsub.f32 %v5014_v44, %v2364_v62 }
 0x4be   : > { %v2369_v57 = vmul.f32 %v2367_v5, %v2365_v3  ;;  %v2370_v61 = vmul.f32 %v2368_v6, %v2366_v31 }
 0x4c0   : > { %v2377_v10 = vmul.f32 %v2373_v1, %v2369_v57  ;;  %v2378_v11 = vmul.f32 %v2374_v2, %v2370_v61 }
 0x4c1   : > { %v2498_v12 = vpop.f32.mrf.mxu2  ;;  %v2511_v13 = vpop.f32.mrf.mxu3 }
 0x4c2   : > { %v2385_v14 = vadd.f32 %v2381_v7, %v2377_v10  ;;  %v2499_v15 = vadd.f32 %v2498_v12, %v2404_v56  ;;  %v2386_v16 = vadd.f32 %v2382_v8, %v2378_v11  ;;  %v2512_v43 = vadd.f32 %v2511_v13, %v2405_v9 }
 0x4c4   : > { %v2515_v17 = vadd.f32 %v2499_v15, %v2385_v14  ;;  %v2516_v18 = vadd.f32 %v2512_v43, %v2386_v16 }
 0x4c6   : > { %2566 = vmatmul.f32.vlgmr.msrb.gmra.mxu1 %v2515_v17  ;;  %3382 = vmatmul.msk.f32.vlgmr.msrb.gmra.mxu0 %vm1238_vm2, %v2516_v18 }
 0x4c9   : > { %v2500_v44 = vpop.f32.mrf.mxu2  ;;  %v2513_v19 = vpop.f32.mrf.mxu3 }
 0x543   : > { %v2567_v20 = vpop.f32.mrf.mxu1  ;;  %v2587_v21 = vpop.f32.mrf.mxu0 }
 0x544   : > { %v2588_v34 = vadd.f32 %v2587_v21, %v2567_v20 }
 0x546   : > { %3673 = vtanh.f32 %v2588_v34 }
 0x54c   : > { %v3674_v22 = vpop.eup %3673 }
 0x54d   : > { %2592 = vst.msk [vmem:[%s736_s22] sm:$0xf] %vm2591_vm1, %v3674_v22 }
 0x54e   : > { %3972 = shalt.err (!%p3969_p8)
}
 0x54f   : > { %3568 = dma.vmem_to_hbm [thread:$0]  (%p4181_p5), %s2607_s8, 64, %s2609_s0, %s2594_s24  }
 0x550 PF: > { %s5239_s29 = sld [smem:[#allocation27_spill]] }
 0x551   : > { %s5240_s28 = sld [smem:[#allocation24_spill]] }
 0x556   : > { %p3620_p9 = scmp.ge.s32.totalorder %s5239_s29, 2 }
 0x557   : > { %s2620_s21 = sand.u32 1, %s5240_s28  }
 0x558   : > { %p3599_p10 = pnand %p3620_p9, %p4185_p6  ;;  %s2621_s20 = scalar_lea.sflag [#allocation4], %s2620_s21 }
 0x55a   : > { %p3600_p11 = pneg %p3599_p10 }
 0x55c   : > { %4010 = dma.done.wait (%p3600_p11), %s2621_s20, 64  }
 0x55d   : > { %4012 = vsyncadd (%p3600_p11), %s2621_s20, 4294967232  ;;  %s5242_s21 = sld [smem:[#allocation28_spill]] }
 0x55e   : > { %s5243_s0 = sld [smem:[#allocation25_spill]] }
 0x55f   : > { %s5244_s30 = sld [smem:[#allocation26_spill]] }
 0x560   : > { %s5245_s20 = sld [smem:[#allocation29_spill]] }
 0x563   : > { %p34_p12 = scmp.ge.s32.totalorder %s5242_s21, 4  }
 0x565   :  { %36 = sbr.rel (!%p34_p12) target bundleno = 17 (0x11), region = 168 }
 0x56a   :  { %2627 = vsyncpa [#allocation3], 1 }
 0x56b   :  { %2629 = vsyncpa [#allocation3 + $0x1], 1 }
 0x56c   :  { %2630 = vsyncpa [#allocation6], 1 }
 0x56d   :  { %2631 = vsyncpa [#allocation9], 1 }
 0x56e   :  { %2632 = vsyncpa [#allocation12], 1 }
 0x56f   :  { %2633 = vsyncpa [#allocation15], 1 }
 0x570   :  { %2634 = vsyncpa [#allocation4], 1 }
 0x571   :  { %2636 = vsyncpa [#allocation4 + $0x1], 1 }

</bundles_post_ra>
